<compile_context>
chip_gen: v7x
topology: tpu7x:2x2x1
jax: 0.10.0
libtpu: 0.0.40
codegen_flags: <defaults>
</compile_context>

<pallas_src>
import functools
import math

import jax
import jax.numpy as jnp
import numpy as np
from jax.experimental import pallas as pl
from jax.experimental.pallas import tpu as pltpu


_PARAM_ORDER = ("ln1_g", "ln1_b",
                "wq", "bq", "wk", "bk", "wv", "bv", "wo", "bo",
                "ln2_g", "ln2_b",
                "w1", "b1", "w2", "b2")
_MATMUL_WEIGHTS = ("wq", "wk", "wv", "wo", "w1", "w2")


def _layer_norm(x, gamma, beta, eps):
    mu = jnp.mean(x, axis=-1, keepdims=True)
    var = jnp.mean((x - mu) ** 2, axis=-1, keepdims=True)
    return (x - mu) * jax.lax.rsqrt(var + eps) * gamma + beta


def _erf(x):
    # Abramowitz & Stegun 7.1.26 (|err| < 1.5e-7).  Built from exp + polynomial so it
    # lowers on every TPU generation without relying on a lax.erf Mosaic rule.
    a1, a2, a3, a4, a5 = 0.254829592, -0.284496736, 1.421413741, -1.453152027, 1.061405429
    pp = 0.3275911
    ax = jnp.abs(x)
    t = 1.0 / (1.0 + pp * ax)
    y = 1.0 - (((((a5 * t + a4) * t + a3) * t + a2) * t + a1) * t) * jnp.exp(-ax * ax)
    return jnp.where(x >= 0.0, y, -y)


def _gelu_exact(x):
    # matches torch.nn.functional.gelu default (erf-based).
    # TODO(synk): evaluate in bf16 on v6e/v7x (bf16 VPU) to halve VALU work.
    return 0.5 * x * (1.0 + _erf(x * (1.0 / math.sqrt(2.0))))


def gpt2_layer_kernel(x_ref, mask_ref,
                      ln1_g_ref, ln1_b_ref,
                      wq_ref, bq_ref, wk_ref, bk_ref, wv_ref, bv_ref,
                      wo_ref, bo_ref,
                      ln2_g_ref, ln2_b_ref,
                      w1_ref, b1_ref, w2_ref, b2_ref,
                      out_ref,
                      q_scr, k_cache, v_cache, m_scr, l_scr, acc_scr, ctx_scr,
                      *, num_heads, eps):
    tile, H = x_ref.shape[1], x_ref.shape[2]
    hd = H // num_heads
    scale = 1.0 / math.sqrt(hd)
    cdt = q_scr.dtype                        # matmul compute dtype (bf16 or f32)

    b = pl.program_id(0)
    qi = pl.program_id(1)
    ki = pl.program_id(2)
    q_start = qi * tile
    k_start = ki * tile

    ln1_g = ln1_g_ref[...]
    ln1_b = ln1_b_ref[...]

    # ---- once per query tile (ki == 0): project Q, reset online-softmax state ----
    @pl.when(ki == 0)
    def _init_q():
        h1 = _layer_norm(x_ref[0], ln1_g, ln1_b, eps)
        qp = jnp.dot(h1.astype(cdt), wq_ref[...],
                     preferred_element_type=jnp.float32) + bq_ref[...]
        qp = qp * scale                      # fold 1/sqrt(hd) into Q once
        for h in range(num_heads):           # TODO(synk): pltpu.einshape for lane-dense pack
            q_scr[h] = qp[:, h * hd:(h + 1) * hd].astype(cdt)
        m_scr[...] = jnp.full(m_scr.shape, -1e30, dtype=m_scr.dtype)
        l_scr[...] = jnp.zeros(l_scr.shape, dtype=l_scr.dtype)
        acc_scr[...] = jnp.zeros(acc_scr.shape, dtype=acc_scr.dtype)

    # ---- once per key tile per batch (diagonal step): project K/V into the cache ----
    @pl.when(qi == ki)
    def _project_kv():
        h1 = _layer_norm(x_ref[0], ln1_g, ln1_b, eps).astype(cdt)
        kp = jnp.dot(h1, wk_ref[...], preferred_element_type=jnp.float32) + bk_ref[...]
        vp = jnp.dot(h1, wv_ref[...], preferred_element_type=jnp.float32) + bv_ref[...]
        for h in range(num_heads):
            k_cache[ki, h] = kp[:, h * hd:(h + 1) * hd].astype(cdt)
            v_cache[ki, h] = vp[:, h * hd:(h + 1) * hd].astype(cdt)

    # ---- flash-style online-softmax update using the cached K/V tile ----
    @pl.when(ki <= qi)                       # key tiles above the causal diagonal skipped
    def _update():
        k_t = k_cache[ki]                    # (nh, tile, hd)
        v_t = v_cache[ki]
        s = jnp.einsum("hqd,hkd->hqk", q_scr[...], k_t,
                       preferred_element_type=jnp.float32)
        # combined causal + padding additive bias, computed once for all heads
        row = q_start + jax.lax.broadcasted_iota(jnp.int32, (tile, tile), 0)
        col = k_start + jax.lax.broadcasted_iota(jnp.int32, (tile, tile), 1)
        bias = jnp.where(col <= row, 0.0, -1e9) + mask_ref[b, ki]    # (tile,tile)+(1,tile)
        s = s + bias[None, :, :]

        m_prev = m_scr[...]
        m_new = jnp.maximum(m_prev, jnp.max(s, axis=-1, keepdims=True))
        alpha = jnp.exp(m_prev - m_new)
        p = jnp.exp(s - m_new)
        l_scr[...] = alpha * l_scr[...] + jnp.sum(p, axis=-1, keepdims=True)
        acc_scr[...] = alpha * acc_scr[...] + jnp.einsum(
            "hqk,hkd->hqd", p.astype(cdt), v_t, preferred_element_type=jnp.float32)
        m_scr[...] = m_new

    # ---- last contributing key tile (the diagonal): out-proj, residual, LN2, FFN ----
    @pl.when(ki == qi)
    def _finalize():
        inv_l = pl.reciprocal(l_scr[...], approx=True)               # (nh, tile, 1)
        for h in range(num_heads):
            ctx_scr[:, h * hd:(h + 1) * hd] = (acc_scr[h] * inv_l[h]).astype(cdt)
        attn = jnp.dot(ctx_scr[...], wo_ref[...],
                       preferred_element_type=jnp.float32) + bo_ref[...]
        # attention_dropout is identity in eval mode.
        x2 = x_ref[0] + attn

        h2 = _layer_norm(x2, ln2_g_ref[...], ln2_b_ref[...], eps)
        inter = jnp.dot(h2.astype(cdt), w1_ref[...],
                        preferred_element_type=jnp.float32) + b1_ref[...]
        inter = _gelu_exact(inter)
        ff = jnp.dot(inter.astype(cdt), w2_ref[...],
                     preferred_element_type=jnp.float32) + b2_ref[...]
        # out_dropout is identity in eval mode.
        out_ref[0] = x2 + ff


def _pick_tile(dim, requested):
    """Largest divisor of `dim` that is <= requested and sublane-aligned (or dim itself)."""
    req = max(1, min(requested, dim))
    best = dim
    for t in range(req, 0, -1):
        if dim % t == 0 and (t % 8 == 0 or t == dim):
            best = t
            break
    if best == dim and dim > 2 * requested:
        raise ValueError(
            f"sequence length {dim} has no tile divisor <= {requested}; pad S to a "
            f"multiple of a reasonable tile size instead of using a full-S block.")
    return best


def gpt2_layer(x, attention_mask, params, *, num_heads, eps=1e-5,
               tile=None, compute_dtype=jnp.bfloat16):
    """x: (B, S, H) f32; attention_mask: (B, S) additive f32 (0 keep / -1e9 mask)."""
    B, S, H = x.shape
    assert H % num_heads == 0
    hd = H // num_heads
    inter_dim = params["w1"].shape[1]
    x = x.astype(jnp.float32)

    # Real per-core VMEM capacity (v5e/v6e 128 MiB, v7x 64 MiB); conservative fallback.
    try:
        vmem_cap = int(getattr(pltpu.get_tpu_info(), "vmem_capacity_bytes", 64 << 20))
    except Exception:
        vmem_cap = 64 << 20

    if tile is None:
        tile = 512 if vmem_cap >= (100 << 20) else 256   # bigger tiles on 128 MiB parts
    tile = _pick_tile(S, tile)
    n_t = S // tile

    # Padding mask reshaped so each (b, key-tile) slice is a clean 2-D read; the whole
    # (tiny) mask stays VMEM-resident -> no per-step or skipped-tile mask DMA.
    mask4 = attention_mask.astype(jnp.float32).reshape(B, n_t, 1, tile)

    # Matmul weights in compute dtype (bf16 halves residency, feeds MXU at native rate);
    # biases / LN params stay f32.
    p = {name: (params[name].astype(compute_dtype) if name in _MATMUL_WEIGHTS
                else params[name].astype(jnp.float32))
         for name in _PARAM_ORDER}

    weight_specs = [pl.BlockSpec(memory_space=pltpu.MemorySpace.VMEM)
                    for _ in _PARAM_ORDER]
    in_specs = [
        pl.BlockSpec((1, tile, H), lambda b, qi, ki: (b, qi, 0)),   # x rows (q == k tiles)
        pl.BlockSpec(memory_space=pltpu.MemorySpace.VMEM),          # resident padding mask
    ] + weight_specs
    out_spec = pl.BlockSpec((1, tile, H), lambda b, qi, ki: (b, qi, 0))

    # --- honest VMEM footprint estimate for vmem_limit_bytes ---
    c_bytes = jnp.dtype(compute_dtype).itemsize
    lane = lambda n: -(-n // 128) * 128
    sub = lambda n: -(-n // 8) * 8
    hd_p, tile_p, H_p = lane(hd), sub(tile), lane(H)
    weight_bytes = sum(int(np.prod(p[n].shape)) * p[n].dtype.itemsize
                       for n in _PARAM_ORDER)
    scratch_bytes = (
        (2 * n_t + 1) * num_heads * tile_p * hd_p * c_bytes     # K/V cache + Q scratch
        + num_heads * tile_p * hd_p * 4                         # ctx accumulator (f32)
        + 2 * num_heads * tile_p * 128 * 4                      # m/l (last dim pads to 128)
        + tile_p * H_p * c_bytes)                               # merged-heads scratch
    block_bytes = 2 * 2 * tile_p * H_p * 4 + B * n_t * 8 * lane(tile) * 4
    transient_bytes = (2 * num_heads * tile_p * lane(tile) * 4  # scores + p
                       + 2 * tile_p * lane(inter_dim) * 4       # FFN intermediate
                       + 4 * tile_p * H_p * 4)                  # LN / residual temporaries
    need = weight_bytes + scratch_bytes + block_bytes + transient_bytes
    vmem_limit = int(max(32 << 20, min(vmem_cap - (2 << 20), int(1.2 * need))))

    kernel = functools.partial(gpt2_layer_kernel, num_heads=num_heads, eps=eps)

    return pl.pallas_call(
        kernel,
        out_shape=jax.ShapeDtypeStruct((B, S, H), jnp.float32),
        grid=(B, n_t, n_t),
        in_specs=in_specs,
        out_specs=out_spec,
        scratch_shapes=[
            pltpu.VMEM((num_heads, tile, hd), compute_dtype),        # Q (pre-scaled)
            pltpu.VMEM((n_t, num_heads, tile, hd), compute_dtype),   # K cache (per batch)
            pltpu.VMEM((n_t, num_heads, tile, hd), compute_dtype),   # V cache (per batch)
            pltpu.VMEM((num_heads, tile, 1), jnp.float32),           # running max
            pltpu.VMEM((num_heads, tile, 1), jnp.float32),           # running denom
            pltpu.VMEM((num_heads, tile, hd), jnp.float32),          # ctx accumulator
            pltpu.VMEM((tile, H), compute_dtype),                    # merged heads
        ],
        compiler_params=pltpu.CompilerParams(
            # K/V tiles are produced on the diagonal step and reused by later query
            # tiles, so the qi/ki axes must iterate sequentially ("arbitrary"); batch is
            # the only megacore-parallel axis.  TODO(synk): for B == 1 on v7x, hoist the
            # QKV projection into its own pallas_call so qi can be "parallel".
            dimension_semantics=("parallel", "arbitrary", "arbitrary"),
            vmem_limit_bytes=vmem_limit),
    )(x, mask4, *[p[name] for name in _PARAM_ORDER])


def init_params(key, hidden, intermediate):
    ks = jax.random.split(key, 14)
    w = lambda k, shape: (0.05 * jax.random.normal(k, shape, jnp.float32))
    return dict(
        ln1_g=1.0 + 0.1 * jax.random.normal(ks[12], (1, hidden), jnp.float32),
        ln1_b=0.1 * jax.random.normal(ks[13], (1, hidden), jnp.float32),
        wq=w(ks[0], (hidden, hidden)), bq=w(ks[1], (1, hidden)),
        wk=w(ks[2], (hidden, hidden)), bk=w(ks[3], (1, hidden)),
        wv=w(ks[4], (hidden, hidden)), bv=w(ks[5], (1, hidden)),
        wo=w(ks[6], (hidden, hidden)), bo=w(ks[7], (1, hidden)),
        ln2_g=jnp.ones((1, hidden), jnp.float32),
        ln2_b=jnp.zeros((1, hidden), jnp.float32),
        w1=w(ks[8], (hidden, intermediate)), b1=w(ks[9], (1, intermediate)),
        w2=w(ks[10], (intermediate, hidden)), b2=w(ks[11], (1, hidden)),
    )


def reference(x, attention_mask, params, *, num_heads, eps=1e-5):
    """Pure-JAX replica of the PyTorch GPT2Layer.forward (eval mode)."""
    B, S, H = x.shape
    hd = H // num_heads

    def ln(t, g, b):
        mu = t.mean(-1, keepdims=True)
        var = ((t - mu) ** 2).mean(-1, keepdims=True)
        return (t - mu) / jnp.sqrt(var + eps) * g + b

    def split(t):
        return t.reshape(B, S, num_heads, hd).transpose(0, 2, 1, 3)

    h1 = ln(x, params["ln1_g"], params["ln1_b"])
    q = split(h1 @ params["wq"] + params["bq"])
    k = split(h1 @ params["wk"] + params["bk"])
    v = split(h1 @ params["wv"] + params["bv"])
    s = jnp.einsum("bhqd,bhkd->bhqk", q, k) / np.sqrt(hd)
    causal = jnp.where(jnp.tril(jnp.ones((S, S), bool)), 0.0, -1e9)
    s = s + causal + attention_mask[:, None, None, :]
    p = jax.nn.softmax(s, axis=-1)
    ctx = jnp.einsum("bhqk,bhkd->bhqd", p, v).transpose(0, 2, 1, 3).reshape(B, S, H)
    x2 = x + ctx @ params["wo"] + params["bo"]
    h2 = ln(x2, params["ln2_g"], params["ln2_b"])
    inter = jax.nn.gelu(h2 @ params["w1"] + params["b1"], approximate=False)
    ff = inter @ params["w2"] + params["b2"]
    return x2 + ff


if __name__ == "__main__":
    B, S, H, NH = 2, 16, 32, 4
    INTERMEDIATE = 4 * H

    key = jax.random.PRNGKey(0)
    k_x, k_p = jax.random.split(key)
    x = jax.random.normal(k_x, (B, S, H), jnp.float32)
    params = init_params(k_p, H, INTERMEDIATE)

    # additive attention mask: batch 1 has its last two key positions masked out
    attention_mask = jnp.zeros((B, S), jnp.float32).at[1, S - 2:].set(-1e9)

    ref = reference(x, attention_mask, params, num_heads=NH)

    # f32 compute path, 2x2 query/key tiles (exercises diagonal K/V caching + causal skip).
    out = gpt2_layer(x, attention_mask, params, num_heads=NH,
                     tile=8, compute_dtype=jnp.float32)
    out = jax.block_until_ready(out)
    np.testing.assert_allclose(np.asarray(out), np.asarray(ref), atol=5e-2, rtol=5e-2)

    # default bf16 MXU-operand path (f32 accumulation / softmax / LN) — looser tolerance.
    out_bf16 = gpt2_layer(x, attention_mask, params, num_heads=NH, tile=8)
    out_bf16 = jax.block_until_ready(out_bf16)
    np.testing.assert_allclose(np.asarray(out_bf16), np.asarray(ref), atol=2e-1, rtol=2e-1)

    print("KERNEL_OK")
</pallas_src>

<mosaic_0001>
module attributes {stable_mosaic.version = 11 : i64} {
  func.func @gpt2_layer_kernel(%arg0: i32, %arg1: i32, %arg2: i32, %arg3: memref<1x8x32xf32, #tpu.memory_space<vmem>>, %arg4: memref<2x2x1x8xf32, #tpu.memory_space<vmem>>, %arg5: memref<1x32xf32, #tpu.memory_space<vmem>>, %arg6: memref<1x32xf32, #tpu.memory_space<vmem>>, %arg7: memref<32x32xf32, #tpu.memory_space<vmem>>, %arg8: memref<1x32xf32, #tpu.memory_space<vmem>>, %arg9: memref<32x32xf32, #tpu.memory_space<vmem>>, %arg10: memref<1x32xf32, #tpu.memory_space<vmem>>, %arg11: memref<32x32xf32, #tpu.memory_space<vmem>>, %arg12: memref<1x32xf32, #tpu.memory_space<vmem>>, %arg13: memref<32x32xf32, #tpu.memory_space<vmem>>, %arg14: memref<1x32xf32, #tpu.memory_space<vmem>>, %arg15: memref<1x32xf32, #tpu.memory_space<vmem>>, %arg16: memref<1x32xf32, #tpu.memory_space<vmem>>, %arg17: memref<32x128xf32, #tpu.memory_space<vmem>>, %arg18: memref<1x128xf32, #tpu.memory_space<vmem>>, %arg19: memref<128x32xf32, #tpu.memory_space<vmem>>, %arg20: memref<1x32xf32, #tpu.memory_space<vmem>>, %arg21: memref<1x8x32xf32, #tpu.memory_space<vmem>>, %arg22: memref<4x8x8xf32, #tpu.memory_space<vmem>>, %arg23: memref<2x4x8x8xf32, #tpu.memory_space<vmem>>, %arg24: memref<2x4x8x8xf32, #tpu.memory_space<vmem>>, %arg25: memref<4x8x1xf32, #tpu.memory_space<vmem>>, %arg26: memref<4x8x1xf32, #tpu.memory_space<vmem>>, %arg27: memref<4x8x8xf32, #tpu.memory_space<vmem>>, %arg28: memref<8x32xf32, #tpu.memory_space<vmem>>) attributes {dimension_semantics = [#tpu.dimension_semantics<parallel>, #tpu.dimension_semantics<arbitrary>, #tpu.dimension_semantics<arbitrary>], iteration_bounds = array<i64: 2, 2, 2>, scalar_prefetch = 0 : i64, scratch_operands = 7 : i64, tpu.core_type = #tpu.core_type<tc>, window_params = [{transform_indices = @transform_0, window_bounds = array<i64: 1, 8, 32>}, {pipeline_mode = #tpu.pipeline_mode<synchronous>, transform_indices = @transform_1, window_bounds = array<i64: 2, 2, 1, 8>}, {pipeline_mode = #tpu.pipeline_mode<synchronous>, transform_indices = @transform_2, window_bounds = array<i64: 1, 32>}, {pipeline_mode = #tpu.pipeline_mode<synchronous>, transform_indices = @transform_3, window_bounds = array<i64: 1, 32>}, {pipeline_mode = #tpu.pipeline_mode<synchronous>, transform_indices = @transform_4, window_bounds = array<i64: 32, 32>}, {pipeline_mode = #tpu.pipeline_mode<synchronous>, transform_indices = @transform_5, window_bounds = array<i64: 1, 32>}, {pipeline_mode = #tpu.pipeline_mode<synchronous>, transform_indices = @transform_6, window_bounds = array<i64: 32, 32>}, {pipeline_mode = #tpu.pipeline_mode<synchronous>, transform_indices = @transform_7, window_bounds = array<i64: 1, 32>}, {pipeline_mode = #tpu.pipeline_mode<synchronous>, transform_indices = @transform_8, window_bounds = array<i64: 32, 32>}, {pipeline_mode = #tpu.pipeline_mode<synchronous>, transform_indices = @transform_9, window_bounds = array<i64: 1, 32>}, {pipeline_mode = #tpu.pipeline_mode<synchronous>, transform_indices = @transform_10, window_bounds = array<i64: 32, 32>}, {pipeline_mode = #tpu.pipeline_mode<synchronous>, transform_indices = @transform_11, window_bounds = array<i64: 1, 32>}, {pipeline_mode = #tpu.pipeline_mode<synchronous>, transform_indices = @transform_12, window_bounds = array<i64: 1, 32>}, {pipeline_mode = #tpu.pipeline_mode<synchronous>, transform_indices = @transform_13, window_bounds = array<i64: 1, 32>}, {pipeline_mode = #tpu.pipeline_mode<synchronous>, transform_indices = @transform_14, window_bounds = array<i64: 32, 128>}, {pipeline_mode = #tpu.pipeline_mode<synchronous>, transform_indices = @transform_15, window_bounds = array<i64: 1, 128>}, {pipeline_mode = #tpu.pipeline_mode<synchronous>, transform_indices = @transform_16, window_bounds = array<i64: 128, 32>}, {pipeline_mode = #tpu.pipeline_mode<synchronous>, transform_indices = @transform_17, window_bounds = array<i64: 1, 32>}, {transform_indices = @transform_18, window_bounds = array<i64: 1, 8, 32>}]} {
    %c8_i32 = arith.constant 8 : i32
    %0 = arith.muli %arg1, %c8_i32 : i32
    %c8_i32_0 = arith.constant 8 : i32
    %1 = arith.muli %arg2, %c8_i32_0 : i32
    %c0 = arith.constant 0 : index
    %c0_1 = arith.constant 0 : index
    %2 = vector.load %arg5[%c0, %c0_1] : memref<1x32xf32, #tpu.memory_space<vmem>>, vector<1x32xf32>
    %c0_2 = arith.constant 0 : index
    %c0_3 = arith.constant 0 : index
    %3 = vector.load %arg6[%c0_2, %c0_3] : memref<1x32xf32, #tpu.memory_space<vmem>>, vector<1x32xf32>
    %c0_i32 = arith.constant 0 : i32
    %4 = arith.cmpi eq, %arg2, %c0_i32 : i32
    %5 = arith.extui %4 : i1 to i32
    %c0_i32_4 = arith.constant 0 : i32
    %6 = arith.cmpi ne, %5, %c0_i32_4 : i32
    scf.if %6 {
      %c0_8 = arith.constant 0 : index
      %c0_9 = arith.constant 0 : index
      %c0_10 = arith.constant 0 : index
      %16 = vector.load %arg3[%c0_8, %c0_9, %c0_10] : memref<1x8x32xf32, #tpu.memory_space<vmem>>, vector<1x8x32xf32>
      %17 = vector.shape_cast %16 : vector<1x8x32xf32> to vector<8x32xf32>
      %cst = arith.constant dense<0.000000e+00> : vector<8xf32>
      %18 = vector.multi_reduction <add>, %17, %cst [1] : vector<8x32xf32> to vector<8xf32>
      %19 = vector.shape_cast %18 : vector<8xf32> to vector<8x1xf32>
      %cst_11 = arith.constant 3.200000e+01 : f32
      %20 = vector.broadcast %cst_11 : f32 to vector<8x1xf32>
      %21 = arith.divf %19, %20 : vector<8x1xf32>
      %22 = vector.broadcast %21 : vector<8x1xf32> to vector<8x32xf32>
      %23 = arith.subf %17, %22 : vector<8x32xf32>
      %24 = arith.mulf %23, %23 : vector<8x32xf32>
      %cst_12 = arith.constant dense<0.000000e+00> : vector<8xf32>
      %25 = vector.multi_reduction <add>, %24, %cst_12 [1] : vector<8x32xf32> to vector<8xf32>
      %26 = vector.shape_cast %25 : vector<8xf32> to vector<8x1xf32>
      %cst_13 = arith.constant 3.200000e+01 : f32
      %27 = vector.broadcast %cst_13 : f32 to vector<8x1xf32>
      %28 = arith.divf %26, %27 : vector<8x1xf32>
      %29 = vector.broadcast %21 : vector<8x1xf32> to vector<8x32xf32>
      %30 = arith.subf %17, %29 : vector<8x32xf32>
      %cst_14 = arith.constant 9.99999974E-6 : f32
      %31 = vector.broadcast %cst_14 : f32 to vector<8x1xf32>
      %32 = arith.addf %28, %31 : vector<8x1xf32>
      %33 = math.rsqrt %32 : vector<8x1xf32>
      %34 = vector.broadcast %33 : vector<8x1xf32> to vector<8x32xf32>
      %35 = arith.mulf %30, %34 : vector<8x32xf32>
      %36 = vector.broadcast %2 : vector<1x32xf32> to vector<8x32xf32>
      %37 = arith.mulf %35, %36 : vector<8x32xf32>
      %38 = vector.broadcast %3 : vector<1x32xf32> to vector<8x32xf32>
      %39 = arith.addf %37, %38 : vector<8x32xf32>
      %c0_15 = arith.constant 0 : index
      %c0_16 = arith.constant 0 : index
      %40 = vector.load %arg7[%c0_15, %c0_16] : memref<32x32xf32, #tpu.memory_space<vmem>>, vector<32x32xf32>
      %cst_17 = arith.constant dense<0.000000e+00> : vector<8x32xf32>
      %41 = tpu.matmul %39, %40, %cst_17 {dimension_numbers = #tpu.dot_dimension_numbers<[1], [0], [0], [1], [0, 0, 1, 1], [], []>} : vector<8x32xf32>, vector<32x32xf32>, vector<8x32xf32> -> vector<8x32xf32>
      %c0_18 = arith.constant 0 : index
      %c0_19 = arith.constant 0 : index
      %42 = vector.load %arg8[%c0_18, %c0_19] : memref<1x32xf32, #tpu.memory_space<vmem>>, vector<1x32xf32>
      %43 = vector.broadcast %42 : vector<1x32xf32> to vector<8x32xf32>
      %44 = arith.addf %41, %43 : vector<8x32xf32>
      %cst_20 = arith.constant 0.353553385 : f32
      %45 = vector.broadcast %cst_20 : f32 to vector<8x32xf32>
      %46 = arith.mulf %44, %45 : vector<8x32xf32>
      %47 = vector.extract_strided_slice %46 {offsets = [0, 0], sizes = [8, 8], strides = [1, 1]} : vector<8x32xf32> to vector<8x8xf32>
      %c0_21 = arith.constant 0 : index
      %c0_22 = arith.constant 0 : index
      %c0_23 = arith.constant 0 : index
      %48 = vector.load %arg22[%c0_21, %c0_22, %c0_23] : memref<4x8x8xf32, #tpu.memory_space<vmem>>, vector<1x8x8xf32>
      %49 = vector.shape_cast %48 : vector<1x8x8xf32> to vector<8x8xf32>
      %50 = vector.shape_cast %47 : vector<8x8xf32> to vector<1x8x8xf32>
      tpu.vector_store %arg22[%c0_21, %c0_22, %c0_23], %50 {strides = array<i32>} : memref<4x8x8xf32, #tpu.memory_space<vmem>>, vector<1x8x8xf32>,
      %51 = vector.extract_strided_slice %46 {offsets = [0, 8], sizes = [8, 8], strides = [1, 1]} : vector<8x32xf32> to vector<8x8xf32>
      %c1 = arith.constant 1 : index
      %c0_24 = arith.constant 0 : index
      %c0_25 = arith.constant 0 : index
      %52 = vector.load %arg22[%c1, %c0_24, %c0_25] : memref<4x8x8xf32, #tpu.memory_space<vmem>>, vector<1x8x8xf32>
      %53 = vector.shape_cast %52 : vector<1x8x8xf32> to vector<8x8xf32>
      %54 = vector.shape_cast %51 : vector<8x8xf32> to vector<1x8x8xf32>
      tpu.vector_store %arg22[%c1, %c0_24, %c0_25], %54 {strides = array<i32>} : memref<4x8x8xf32, #tpu.memory_space<vmem>>, vector<1x8x8xf32>,
      %55 = vector.extract_strided_slice %46 {offsets = [0, 16], sizes = [8, 8], strides = [1, 1]} : vector<8x32xf32> to vector<8x8xf32>
      %c2 = arith.constant 2 : index
      %c0_26 = arith.constant 0 : index
      %c0_27 = arith.constant 0 : index
      %56 = vector.load %arg22[%c2, %c0_26, %c0_27] : memref<4x8x8xf32, #tpu.memory_space<vmem>>, vector<1x8x8xf32>
      %57 = vector.shape_cast %56 : vector<1x8x8xf32> to vector<8x8xf32>
      %58 = vector.shape_cast %55 : vector<8x8xf32> to vector<1x8x8xf32>
      tpu.vector_store %arg22[%c2, %c0_26, %c0_27], %58 {strides = array<i32>} : memref<4x8x8xf32, #tpu.memory_space<vmem>>, vector<1x8x8xf32>,
      %59 = vector.extract_strided_slice %46 {offsets = [0, 24], sizes = [8, 8], strides = [1, 1]} : vector<8x32xf32> to vector<8x8xf32>
      %c3 = arith.constant 3 : index
      %c0_28 = arith.constant 0 : index
      %c0_29 = arith.constant 0 : index
      %60 = vector.load %arg22[%c3, %c0_28, %c0_29] : memref<4x8x8xf32, #tpu.memory_space<vmem>>, vector<1x8x8xf32>
      %61 = vector.shape_cast %60 : vector<1x8x8xf32> to vector<8x8xf32>
      %62 = vector.shape_cast %59 : vector<8x8xf32> to vector<1x8x8xf32>
      tpu.vector_store %arg22[%c3, %c0_28, %c0_29], %62 {strides = array<i32>} : memref<4x8x8xf32, #tpu.memory_space<vmem>>, vector<1x8x8xf32>,
      %cst_30 = arith.constant -1.000000e+30 : f32
      %63 = vector.broadcast %cst_30 : f32 to vector<4x8x1xf32>
      %c0_31 = arith.constant 0 : index
      %c0_32 = arith.constant 0 : index
      %c0_33 = arith.constant 0 : index
      %64 = vector.load %arg25[%c0_31, %c0_32, %c0_33] : memref<4x8x1xf32, #tpu.memory_space<vmem>>, vector<4x8x1xf32>
      tpu.vector_store %arg25[%c0_31, %c0_32, %c0_33], %63 {strides = array<i32>} : memref<4x8x1xf32, #tpu.memory_space<vmem>>, vector<4x8x1xf32>,
      %cst_34 = arith.constant 0.000000e+00 : f32
      %65 = vector.broadcast %cst_34 : f32 to vector<4x8x1xf32>
      %c0_35 = arith.constant 0 : index
      %c0_36 = arith.constant 0 : index
      %c0_37 = arith.constant 0 : index
      %66 = vector.load %arg26[%c0_35, %c0_36, %c0_37] : memref<4x8x1xf32, #tpu.memory_space<vmem>>, vector<4x8x1xf32>
      tpu.vector_store %arg26[%c0_35, %c0_36, %c0_37], %65 {strides = array<i32>} : memref<4x8x1xf32, #tpu.memory_space<vmem>>, vector<4x8x1xf32>,
      %cst_38 = arith.constant 0.000000e+00 : f32
      %67 = vector.broadcast %cst_38 : f32 to vector<4x8x8xf32>
      %c0_39 = arith.constant 0 : index
      %c0_40 = arith.constant 0 : index
      %c0_41 = arith.constant 0 : index
      %68 = vector.load %arg27[%c0_39, %c0_40, %c0_41] : memref<4x8x8xf32, #tpu.memory_space<vmem>>, vector<4x8x8xf32>
      tpu.vector_store %arg27[%c0_39, %c0_40, %c0_41], %67 {strides = array<i32>} : memref<4x8x8xf32, #tpu.memory_space<vmem>>, vector<4x8x8xf32>,
    } else {
    }
    %7 = arith.cmpi eq, %arg1, %arg2 : i32
    %8 = arith.extui %7 : i1 to i32
    %c0_i32_5 = arith.constant 0 : i32
    %9 = arith.cmpi ne, %8, %c0_i32_5 : i32
    scf.if %9 {
      %c0_8 = arith.constant 0 : index
      %c0_9 = arith.constant 0 : index
      %c0_10 = arith.constant 0 : index
      %16 = vector.load %arg3[%c0_8, %c0_9, %c0_10] : memref<1x8x32xf32, #tpu.memory_space<vmem>>, vector<1x8x32xf32>
      %17 = vector.shape_cast %16 : vector<1x8x32xf32> to vector<8x32xf32>
      %cst = arith.constant dense<0.000000e+00> : vector<8xf32>
      %18 = vector.multi_reduction <add>, %17, %cst [1] : vector<8x32xf32> to vector<8xf32>
      %19 = vector.shape_cast %18 : vector<8xf32> to vector<8x1xf32>
      %cst_11 = arith.constant 3.200000e+01 : f32
      %20 = vector.broadcast %cst_11 : f32 to vector<8x1xf32>
      %21 = arith.divf %19, %20 : vector<8x1xf32>
      %22 = vector.broadcast %21 : vector<8x1xf32> to vector<8x32xf32>
      %23 = arith.subf %17, %22 : vector<8x32xf32>
      %24 = arith.mulf %23, %23 : vector<8x32xf32>
      %cst_12 = arith.constant dense<0.000000e+00> : vector<8xf32>
      %25 = vector.multi_reduction <add>, %24, %cst_12 [1] : vector<8x32xf32> to vector<8xf32>
      %26 = vector.shape_cast %25 : vector<8xf32> to vector<8x1xf32>
      %cst_13 = arith.constant 3.200000e+01 : f32
      %27 = vector.broadcast %cst_13 : f32 to vector<8x1xf32>
      %28 = arith.divf %26, %27 : vector<8x1xf32>
      %29 = vector.broadcast %21 : vector<8x1xf32> to vector<8x32xf32>
      %30 = arith.subf %17, %29 : vector<8x32xf32>
      %cst_14 = arith.constant 9.99999974E-6 : f32
      %31 = vector.broadcast %cst_14 : f32 to vector<8x1xf32>
      %32 = arith.addf %28, %31 : vector<8x1xf32>
      %33 = math.rsqrt %32 : vector<8x1xf32>
      %34 = vector.broadcast %33 : vector<8x1xf32> to vector<8x32xf32>
      %35 = arith.mulf %30, %34 : vector<8x32xf32>
      %36 = vector.broadcast %2 : vector<1x32xf32> to vector<8x32xf32>
      %37 = arith.mulf %35, %36 : vector<8x32xf32>
      %38 = vector.broadcast %3 : vector<1x32xf32> to vector<8x32xf32>
      %39 = arith.addf %37, %38 : vector<8x32xf32>
      %c0_15 = arith.constant 0 : index
      %c0_16 = arith.constant 0 : index
      %40 = vector.load %arg9[%c0_15, %c0_16] : memref<32x32xf32, #tpu.memory_space<vmem>>, vector<32x32xf32>
      %cst_17 = arith.constant dense<0.000000e+00> : vector<8x32xf32>
      %41 = tpu.matmul %39, %40, %cst_17 {dimension_numbers = #tpu.dot_dimension_numbers<[1], [0], [0], [1], [0, 0, 1, 1], [], []>} : vector<8x32xf32>, vector<32x32xf32>, vector<8x32xf32> -> vector<8x32xf32>
      %c0_18 = arith.constant 0 : index
      %c0_19 = arith.constant 0 : index
      %42 = vector.load %arg10[%c0_18, %c0_19] : memref<1x32xf32, #tpu.memory_space<vmem>>, vector<1x32xf32>
      %43 = vector.broadcast %42 : vector<1x32xf32> to vector<8x32xf32>
      %44 = arith.addf %41, %43 : vector<8x32xf32>
      %c0_20 = arith.constant 0 : index
      %c0_21 = arith.constant 0 : index
      %45 = vector.load %arg11[%c0_20, %c0_21] : memref<32x32xf32, #tpu.memory_space<vmem>>, vector<32x32xf32>
      %cst_22 = arith.constant dense<0.000000e+00> : vector<8x32xf32>
      %46 = tpu.matmul %39, %45, %cst_22 {dimension_numbers = #tpu.dot_dimension_numbers<[1], [0], [0], [1], [0, 0, 1, 1], [], []>} : vector<8x32xf32>, vector<32x32xf32>, vector<8x32xf32> -> vector<8x32xf32>
      %c0_23 = arith.constant 0 : index
      %c0_24 = arith.constant 0 : index
      %47 = vector.load %arg12[%c0_23, %c0_24] : memref<1x32xf32, #tpu.memory_space<vmem>>, vector<1x32xf32>
      %48 = vector.broadcast %47 : vector<1x32xf32> to vector<8x32xf32>
      %49 = arith.addf %46, %48 : vector<8x32xf32>
      %50 = vector.extract_strided_slice %44 {offsets = [0, 0], sizes = [8, 8], strides = [1, 1]} : vector<8x32xf32> to vector<8x8xf32>
      %51 = arith.index_cast %arg2 : i32 to index
      %c0_25 = arith.constant 0 : index
      %c0_26 = arith.constant 0 : index
      %c0_27 = arith.constant 0 : index
      %52 = vector.load %arg23[%51, %c0_25, %c0_26, %c0_27] : memref<2x4x8x8xf32, #tpu.memory_space<vmem>>, vector<1x1x8x8xf32>
      %53 = vector.shape_cast %52 : vector<1x1x8x8xf32> to vector<8x8xf32>
      %54 = vector.shape_cast %50 : vector<8x8xf32> to vector<1x1x8x8xf32>
      tpu.vector_store %arg23[%51, %c0_25, %c0_26, %c0_27], %54 {strides = array<i32>} : memref<2x4x8x8xf32, #tpu.memory_space<vmem>>, vector<1x1x8x8xf32>,
      %55 = vector.extract_strided_slice %49 {offsets = [0, 0], sizes = [8, 8], strides = [1, 1]} : vector<8x32xf32> to vector<8x8xf32>
      %56 = arith.index_cast %arg2 : i32 to index
      %c0_28 = arith.constant 0 : index
      %c0_29 = arith.constant 0 : index
      %c0_30 = arith.constant 0 : index
      %57 = vector.load %arg24[%56, %c0_28, %c0_29, %c0_30] : memref<2x4x8x8xf32, #tpu.memory_space<vmem>>, vector<1x1x8x8xf32>
      %58 = vector.shape_cast %57 : vector<1x1x8x8xf32> to vector<8x8xf32>
      %59 = vector.shape_cast %55 : vector<8x8xf32> to vector<1x1x8x8xf32>
      tpu.vector_store %arg24[%56, %c0_28, %c0_29, %c0_30], %59 {strides = array<i32>} : memref<2x4x8x8xf32, #tpu.memory_space<vmem>>, vector<1x1x8x8xf32>,
      %60 = vector.extract_strided_slice %44 {offsets = [0, 8], sizes = [8, 8], strides = [1, 1]} : vector<8x32xf32> to vector<8x8xf32>
      %61 = arith.index_cast %arg2 : i32 to index
      %c1 = arith.constant 1 : index
      %c0_31 = arith.constant 0 : index
      %c0_32 = arith.constant 0 : index
      %62 = vector.load %arg23[%61, %c1, %c0_31, %c0_32] : memref<2x4x8x8xf32, #tpu.memory_space<vmem>>, vector<1x1x8x8xf32>
      %63 = vector.shape_cast %62 : vector<1x1x8x8xf32> to vector<8x8xf32>
      %64 = vector.shape_cast %60 : vector<8x8xf32> to vector<1x1x8x8xf32>
      tpu.vector_store %arg23[%61, %c1, %c0_31, %c0_32], %64 {strides = array<i32>} : memref<2x4x8x8xf32, #tpu.memory_space<vmem>>, vector<1x1x8x8xf32>,
      %65 = vector.extract_strided_slice %49 {offsets = [0, 8], sizes = [8, 8], strides = [1, 1]} : vector<8x32xf32> to vector<8x8xf32>
      %66 = arith.index_cast %arg2 : i32 to index
      %c1_33 = arith.constant 1 : index
      %c0_34 = arith.constant 0 : index
      %c0_35 = arith.constant 0 : index
      %67 = vector.load %arg24[%66, %c1_33, %c0_34, %c0_35] : memref<2x4x8x8xf32, #tpu.memory_space<vmem>>, vector<1x1x8x8xf32>
      %68 = vector.shape_cast %67 : vector<1x1x8x8xf32> to vector<8x8xf32>
      %69 = vector.shape_cast %65 : vector<8x8xf32> to vector<1x1x8x8xf32>
      tpu.vector_store %arg24[%66, %c1_33, %c0_34, %c0_35], %69 {strides = array<i32>} : memref<2x4x8x8xf32, #tpu.memory_space<vmem>>, vector<1x1x8x8xf32>,
      %70 = vector.extract_strided_slice %44 {offsets = [0, 16], sizes = [8, 8], strides = [1, 1]} : vector<8x32xf32> to vector<8x8xf32>
      %71 = arith.index_cast %arg2 : i32 to index
      %c2 = arith.constant 2 : index
      %c0_36 = arith.constant 0 : index
      %c0_37 = arith.constant 0 : index
      %72 = vector.load %arg23[%71, %c2, %c0_36, %c0_37] : memref<2x4x8x8xf32, #tpu.memory_space<vmem>>, vector<1x1x8x8xf32>
      %73 = vector.shape_cast %72 : vector<1x1x8x8xf32> to vector<8x8xf32>
      %74 = vector.shape_cast %70 : vector<8x8xf32> to vector<1x1x8x8xf32>
      tpu.vector_store %arg23[%71, %c2, %c0_36, %c0_37], %74 {strides = array<i32>} : memref<2x4x8x8xf32, #tpu.memory_space<vmem>>, vector<1x1x8x8xf32>,
      %75 = vector.extract_strided_slice %49 {offsets = [0, 16], sizes = [8, 8], strides = [1, 1]} : vector<8x32xf32> to vector<8x8xf32>
      %76 = arith.index_cast %arg2 : i32 to index
      %c2_38 = arith.constant 2 : index
      %c0_39 = arith.constant 0 : index
      %c0_40 = arith.constant 0 : index
      %77 = vector.load %arg24[%76, %c2_38, %c0_39, %c0_40] : memref<2x4x8x8xf32, #tpu.memory_space<vmem>>, vector<1x1x8x8xf32>
      %78 = vector.shape_cast %77 : vector<1x1x8x8xf32> to vector<8x8xf32>
      %79 = vector.shape_cast %75 : vector<8x8xf32> to vector<1x1x8x8xf32>
      tpu.vector_store %arg24[%76, %c2_38, %c0_39, %c0_40], %79 {strides = array<i32>} : memref<2x4x8x8xf32, #tpu.memory_space<vmem>>, vector<1x1x8x8xf32>,
      %80 = vector.extract_strided_slice %44 {offsets = [0, 24], sizes = [8, 8], strides = [1, 1]} : vector<8x32xf32> to vector<8x8xf32>
      %81 = arith.index_cast %arg2 : i32 to index
      %c3 = arith.constant 3 : index
      %c0_41 = arith.constant 0 : index
      %c0_42 = arith.constant 0 : index
      %82 = vector.load %arg23[%81, %c3, %c0_41, %c0_42] : memref<2x4x8x8xf32, #tpu.memory_space<vmem>>, vector<1x1x8x8xf32>
      %83 = vector.shape_cast %82 : vector<1x1x8x8xf32> to vector<8x8xf32>
      %84 = vector.shape_cast %80 : vector<8x8xf32> to vector<1x1x8x8xf32>
      tpu.vector_store %arg23[%81, %c3, %c0_41, %c0_42], %84 {strides = array<i32>} : memref<2x4x8x8xf32, #tpu.memory_space<vmem>>, vector<1x1x8x8xf32>,
      %85 = vector.extract_strided_slice %49 {offsets = [0, 24], sizes = [8, 8], strides = [1, 1]} : vector<8x32xf32> to vector<8x8xf32>
      %86 = arith.index_cast %arg2 : i32 to index
      %c3_43 = arith.constant 3 : index
      %c0_44 = arith.constant 0 : index
      %c0_45 = arith.constant 0 : index
      %87 = vector.load %arg24[%86, %c3_43, %c0_44, %c0_45] : memref<2x4x8x8xf32, #tpu.memory_space<vmem>>, vector<1x1x8x8xf32>
      %88 = vector.shape_cast %87 : vector<1x1x8x8xf32> to vector<8x8xf32>
      %89 = vector.shape_cast %85 : vector<8x8xf32> to vector<1x1x8x8xf32>
      tpu.vector_store %arg24[%86, %c3_43, %c0_44, %c0_45], %89 {strides = array<i32>} : memref<2x4x8x8xf32, #tpu.memory_space<vmem>>, vector<1x1x8x8xf32>,
    } else {
    }
    %10 = arith.cmpi sle, %arg2, %arg1 : i32
    %11 = arith.extui %10 : i1 to i32
    %c0_i32_6 = arith.constant 0 : i32
    %12 = arith.cmpi ne, %11, %c0_i32_6 : i32
    scf.if %12 {
      %16 = arith.index_cast %arg2 : i32 to index
      %c0_8 = arith.constant 0 : index
      %c0_9 = arith.constant 0 : index
      %c0_10 = arith.constant 0 : index
      %17 = vector.load %arg23[%16, %c0_8, %c0_9, %c0_10] : memref<2x4x8x8xf32, #tpu.memory_space<vmem>>, vector<1x4x8x8xf32>
      %18 = vector.shape_cast %17 : vector<1x4x8x8xf32> to vector<4x8x8xf32>
      %19 = arith.index_cast %arg2 : i32 to index
      %c0_11 = arith.constant 0 : index
      %c0_12 = arith.constant 0 : index
      %c0_13 = arith.constant 0 : index
      %20 = vector.load %arg24[%19, %c0_11, %c0_12, %c0_13] : memref<2x4x8x8xf32, #tpu.memory_space<vmem>>, vector<1x4x8x8xf32>
      %21 = vector.shape_cast %20 : vector<1x4x8x8xf32> to vector<4x8x8xf32>
      %c0_14 = arith.constant 0 : index
      %c0_15 = arith.constant 0 : index
      %c0_16 = arith.constant 0 : index
      %22 = vector.load %arg22[%c0_14, %c0_15, %c0_16] : memref<4x8x8xf32, #tpu.memory_space<vmem>>, vector<4x8x8xf32>
      "tpu.trace_start"() <{level = 10 : i32, message = "hqd,hkd->hqk"}> : () -> ()
      %cst = arith.constant dense<0.000000e+00> : vector<4x8x8xf32>
      %23 = tpu.matmul %22, %18, %cst {dimension_numbers = #tpu.dot_dimension_numbers<[2], [2], [1], [1], [0, 0, 0, 1, 1, 1], [0], [0]>} : vector<4x8x8xf32>, vector<4x8x8xf32>, vector<4x8x8xf32> -> vector<4x8x8xf32>
      "tpu.trace_stop"() : () -> ()
      %24 = tpu.iota {dimensions = array<i32: 0>} : vector<8x8xi32>
      %25 = vector.broadcast %0 : i32 to vector<8x8xi32>
      %26 = arith.addi %25, %24 : vector<8x8xi32>
      %27 = tpu.iota {dimensions = array<i32: 1>} : vector<8x8xi32>
      %28 = vector.broadcast %1 : i32 to vector<8x8xi32>
      %29 = arith.addi %28, %27 : vector<8x8xi32>
      %30 = arith.cmpi sle, %29, %26 : vector<8x8xi32>
      %cst_17 = arith.constant 0.000000e+00 : f32
      %cst_18 = arith.constant -1.000000e+09 : f32
      %31 = vector.broadcast %cst_17 : f32 to vector<8x8xf32>
      %32 = vector.broadcast %cst_18 : f32 to vector<8x8xf32>
      %33 = arith.select %30, %31, %32 : vector<8x8xi1>, vector<8x8xf32>
      %34 = arith.index_cast %arg0 : i32 to index
      %35 = arith.index_cast %arg2 : i32 to index
      %c0_19 = arith.constant 0 : index
      %c0_20 = arith.constant 0 : index
      %36 = vector.load %arg4[%34, %35, %c0_19, %c0_20] : memref<2x2x1x8xf32, #tpu.memory_space<vmem>>, vector<1x1x1x8xf32>
      %37 = vector.shape_cast %36 : vector<1x1x1x8xf32> to vector<1x8xf32>
      %38 = vector.broadcast %37 : vector<1x8xf32> to vector<8x8xf32>
      %39 = arith.addf %33, %38 : vector<8x8xf32>
      %40 = vector.shape_cast %39 : vector<8x8xf32> to vector<1x8x8xf32>
      %41 = vector.broadcast %40 : vector<1x8x8xf32> to vector<4x8x8xf32>
      %42 = arith.addf %23, %41 : vector<4x8x8xf32>
      %c0_21 = arith.constant 0 : index
      %c0_22 = arith.constant 0 : index
      %c0_23 = arith.constant 0 : index
      %43 = vector.load %arg25[%c0_21, %c0_22, %c0_23] : memref<4x8x1xf32, #tpu.memory_space<vmem>>, vector<4x8x1xf32>
      %cst_24 = arith.constant dense<0xFF800000> : vector<4x8xf32>
      %44 = vector.multi_reduction <maximumf>, %42, %cst_24 [2] : vector<4x8x8xf32> to vector<4x8xf32>
      %45 = vector.shape_cast %44 : vector<4x8xf32> to vector<4x8x1xf32>
      %46 = arith.maximumf %43, %45 : vector<4x8x1xf32>
      %47 = arith.subf %43, %46 : vector<4x8x1xf32>
      %48 = math.exp %47 : vector<4x8x1xf32>
      %49 = vector.broadcast %46 : vector<4x8x1xf32> to vector<4x8x8xf32>
      %50 = arith.subf %42, %49 : vector<4x8x8xf32>
      %51 = math.exp %50 : vector<4x8x8xf32>
      %c0_25 = arith.constant 0 : index
      %c0_26 = arith.constant 0 : index
      %c0_27 = arith.constant 0 : index
      %52 = vector.load %arg26[%c0_25, %c0_26, %c0_27] : memref<4x8x1xf32, #tpu.memory_space<vmem>>, vector<4x8x1xf32>
      %53 = arith.mulf %48, %52 : vector<4x8x1xf32>
      %cst_28 = arith.constant dense<0.000000e+00> : vector<4x8xf32>
      %54 = vector.multi_reduction <add>, %51, %cst_28 [2] : vector<4x8x8xf32> to vector<4x8xf32>
      %55 = vector.shape_cast %54 : vector<4x8xf32> to vector<4x8x1xf32>
      %56 = arith.addf %53, %55 : vector<4x8x1xf32>
      %c0_29 = arith.constant 0 : index
      %c0_30 = arith.constant 0 : index
      %c0_31 = arith.constant 0 : index
      %57 = vector.load %arg26[%c0_29, %c0_30, %c0_31] : memref<4x8x1xf32, #tpu.memory_space<vmem>>, vector<4x8x1xf32>
      tpu.vector_store %arg26[%c0_29, %c0_30, %c0_31], %56 {strides = array<i32>} : memref<4x8x1xf32, #tpu.memory_space<vmem>>, vector<4x8x1xf32>,
      %c0_32 = arith.constant 0 : index
      %c0_33 = arith.constant 0 : index
      %c0_34 = arith.constant 0 : index
      %58 = vector.load %arg27[%c0_32, %c0_33, %c0_34] : memref<4x8x8xf32, #tpu.memory_space<vmem>>, vector<4x8x8xf32>
      %59 = vector.broadcast %48 : vector<4x8x1xf32> to vector<4x8x8xf32>
      %60 = arith.mulf %59, %58 : vector<4x8x8xf32>
      "tpu.trace_start"() <{level = 10 : i32, message = "hqk,hkd->hqd"}> : () -> ()
      %cst_35 = arith.constant dense<0.000000e+00> : vector<4x8x8xf32>
      %61 = tpu.matmul %51, %21, %cst_35 {dimension_numbers = #tpu.dot_dimension_numbers<[2], [1], [1], [2], [0, 0, 0, 1, 1, 2], [0], [0]>} : vector<4x8x8xf32>, vector<4x8x8xf32>, vector<4x8x8xf32> -> vector<4x8x8xf32>
      "tpu.trace_stop"() : () -> ()
      %62 = arith.addf %60, %61 : vector<4x8x8xf32>
      %c0_36 = arith.constant 0 : index
      %c0_37 = arith.constant 0 : index
      %c0_38 = arith.constant 0 : index
      %63 = vector.load %arg27[%c0_36, %c0_37, %c0_38] : memref<4x8x8xf32, #tpu.memory_space<vmem>>, vector<4x8x8xf32>
      tpu.vector_store %arg27[%c0_36, %c0_37, %c0_38], %62 {strides = array<i32>} : memref<4x8x8xf32, #tpu.memory_space<vmem>>, vector<4x8x8xf32>,
      %c0_39 = arith.constant 0 : index
      %c0_40 = arith.constant 0 : index
      %c0_41 = arith.constant 0 : index
      %64 = vector.load %arg25[%c0_39, %c0_40, %c0_41] : memref<4x8x1xf32, #tpu.memory_space<vmem>>, vector<4x8x1xf32>
      tpu.vector_store %arg25[%c0_39, %c0_40, %c0_41], %46 {strides = array<i32>} : memref<4x8x1xf32, #tpu.memory_space<vmem>>, vector<4x8x1xf32>,
    } else {
    }
    %13 = arith.cmpi eq, %arg2, %arg1 : i32
    %14 = arith.extui %13 : i1 to i32
    %c0_i32_7 = arith.constant 0 : i32
    %15 = arith.cmpi ne, %14, %c0_i32_7 : i32
    scf.if %15 {
      %c0_8 = arith.constant 0 : index
      %c0_9 = arith.constant 0 : index
      %c0_10 = arith.constant 0 : index
      %16 = vector.load %arg26[%c0_8, %c0_9, %c0_10] : memref<4x8x1xf32, #tpu.memory_space<vmem>>, vector<4x8x1xf32>
      %17 = tpu.reciprocal %16 {approx = true} : vector<4x8x1xf32> -> vector<4x8x1xf32>
      %c0_11 = arith.constant 0 : index
      %c0_12 = arith.constant 0 : index
      %c0_13 = arith.constant 0 : index
      %18 = vector.load %arg27[%c0_11, %c0_12, %c0_13] : memref<4x8x8xf32, #tpu.memory_space<vmem>>, vector<1x8x8xf32>
      %19 = vector.shape_cast %18 : vector<1x8x8xf32> to vector<8x8xf32>
      %20 = vector.extract_strided_slice %17 {offsets = [0, 0, 0], sizes = [1, 8, 1], strides = [1, 1, 1]} : vector<4x8x1xf32> to vector<1x8x1xf32>
      %21 = vector.shape_cast %20 : vector<1x8x1xf32> to vector<8x1xf32>
      %22 = vector.broadcast %21 : vector<8x1xf32> to vector<8x8xf32>
      %23 = arith.mulf %19, %22 : vector<8x8xf32>
      %c0_14 = arith.constant 0 : index
      %c0_15 = arith.constant 0 : index
      %24 = vector.load %arg28[%c0_14, %c0_15] : memref<8x32xf32, #tpu.memory_space<vmem>>, vector<8x8xf32>
      tpu.vector_store %arg28[%c0_14, %c0_15], %23 {strides = array<i32>} : memref<8x32xf32, #tpu.memory_space<vmem>>, vector<8x8xf32>,
      %c1 = arith.constant 1 : index
      %c0_16 = arith.constant 0 : index
      %c0_17 = arith.constant 0 : index
      %25 = vector.load %arg27[%c1, %c0_16, %c0_17] : memref<4x8x8xf32, #tpu.memory_space<vmem>>, vector<1x8x8xf32>
      %26 = vector.shape_cast %25 : vector<1x8x8xf32> to vector<8x8xf32>
      %27 = vector.extract_strided_slice %17 {offsets = [1, 0, 0], sizes = [1, 8, 1], strides = [1, 1, 1]} : vector<4x8x1xf32> to vector<1x8x1xf32>
      %28 = vector.shape_cast %27 : vector<1x8x1xf32> to vector<8x1xf32>
      %29 = vector.broadcast %28 : vector<8x1xf32> to vector<8x8xf32>
      %30 = arith.mulf %26, %29 : vector<8x8xf32>
      %c0_18 = arith.constant 0 : index
      %c8 = arith.constant 8 : index
      %31 = vector.load %arg28[%c0_18, %c8] : memref<8x32xf32, #tpu.memory_space<vmem>>, vector<8x8xf32>
      tpu.vector_store %arg28[%c0_18, %c8], %30 {strides = array<i32>} : memref<8x32xf32, #tpu.memory_space<vmem>>, vector<8x8xf32>,
      %c2 = arith.constant 2 : index
      %c0_19 = arith.constant 0 : index
      %c0_20 = arith.constant 0 : index
      %32 = vector.load %arg27[%c2, %c0_19, %c0_20] : memref<4x8x8xf32, #tpu.memory_space<vmem>>, vector<1x8x8xf32>
      %33 = vector.shape_cast %32 : vector<1x8x8xf32> to vector<8x8xf32>
      %34 = vector.extract_strided_slice %17 {offsets = [2, 0, 0], sizes = [1, 8, 1], strides = [1, 1, 1]} : vector<4x8x1xf32> to vector<1x8x1xf32>
      %35 = vector.shape_cast %34 : vector<1x8x1xf32> to vector<8x1xf32>
      %36 = vector.broadcast %35 : vector<8x1xf32> to vector<8x8xf32>
      %37 = arith.mulf %33, %36 : vector<8x8xf32>
      %c0_21 = arith.constant 0 : index
      %c16 = arith.constant 16 : index
      %38 = vector.load %arg28[%c0_21, %c16] : memref<8x32xf32, #tpu.memory_space<vmem>>, vector<8x8xf32>
      tpu.vector_store %arg28[%c0_21, %c16], %37 {strides = array<i32>} : memref<8x32xf32, #tpu.memory_space<vmem>>, vector<8x8xf32>,
      %c3 = arith.constant 3 : index
      %c0_22 = arith.constant 0 : index
      %c0_23 = arith.constant 0 : index
      %39 = vector.load %arg27[%c3, %c0_22, %c0_23] : memref<4x8x8xf32, #tpu.memory_space<vmem>>, vector<1x8x8xf32>
      %40 = vector.shape_cast %39 : vector<1x8x8xf32> to vector<8x8xf32>
      %41 = vector.extract_strided_slice %17 {offsets = [3, 0, 0], sizes = [1, 8, 1], strides = [1, 1, 1]} : vector<4x8x1xf32> to vector<1x8x1xf32>
      %42 = vector.shape_cast %41 : vector<1x8x1xf32> to vector<8x1xf32>
      %43 = vector.broadcast %42 : vector<8x1xf32> to vector<8x8xf32>
      %44 = arith.mulf %40, %43 : vector<8x8xf32>
      %c0_24 = arith.constant 0 : index
      %c24 = arith.constant 24 : index
      %45 = vector.load %arg28[%c0_24, %c24] : memref<8x32xf32, #tpu.memory_space<vmem>>, vector<8x8xf32>
      tpu.vector_store %arg28[%c0_24, %c24], %44 {strides = array<i32>} : memref<8x32xf32, #tpu.memory_space<vmem>>, vector<8x8xf32>,
      %c0_25 = arith.constant 0 : index
      %c0_26 = arith.constant 0 : index
      %46 = vector.load %arg28[%c0_25, %c0_26] : memref<8x32xf32, #tpu.memory_space<vmem>>, vector<8x32xf32>
      %c0_27 = arith.constant 0 : index
      %c0_28 = arith.constant 0 : index
      %47 = vector.load %arg13[%c0_27, %c0_28] : memref<32x32xf32, #tpu.memory_space<vmem>>, vector<32x32xf32>
      %cst = arith.constant dense<0.000000e+00> : vector<8x32xf32>
      %48 = tpu.matmul %46, %47, %cst {dimension_numbers = #tpu.dot_dimension_numbers<[1], [0], [0], [1], [0, 0, 1, 1], [], []>} : vector<8x32xf32>, vector<32x32xf32>, vector<8x32xf32> -> vector<8x32xf32>
      %c0_29 = arith.constant 0 : index
      %c0_30 = arith.constant 0 : index
      %49 = vector.load %arg14[%c0_29, %c0_30] : memref<1x32xf32, #tpu.memory_space<vmem>>, vector<1x32xf32>
      %50 = vector.broadcast %49 : vector<1x32xf32> to vector<8x32xf32>
      %51 = arith.addf %48, %50 : vector<8x32xf32>
      %c0_31 = arith.constant 0 : index
      %c0_32 = arith.constant 0 : index
      %c0_33 = arith.constant 0 : index
      %52 = vector.load %arg3[%c0_31, %c0_32, %c0_33] : memref<1x8x32xf32, #tpu.memory_space<vmem>>, vector<1x8x32xf32>
      %53 = vector.shape_cast %52 : vector<1x8x32xf32> to vector<8x32xf32>
      %54 = arith.addf %53, %51 : vector<8x32xf32>
      %c0_34 = arith.constant 0 : index
      %c0_35 = arith.constant 0 : index
      %55 = vector.load %arg15[%c0_34, %c0_35] : memref<1x32xf32, #tpu.memory_space<vmem>>, vector<1x32xf32>
      %c0_36 = arith.constant 0 : index
      %c0_37 = arith.constant 0 : index
      %56 = vector.load %arg16[%c0_36, %c0_37] : memref<1x32xf32, #tpu.memory_space<vmem>>, vector<1x32xf32>
      %cst_38 = arith.constant dense<0.000000e+00> : vector<8xf32>
      %57 = vector.multi_reduction <add>, %54, %cst_38 [1] : vector<8x32xf32> to vector<8xf32>
      %58 = vector.shape_cast %57 : vector<8xf32> to vector<8x1xf32>
      %cst_39 = arith.constant 3.200000e+01 : f32
      %59 = vector.broadcast %cst_39 : f32 to vector<8x1xf32>
      %60 = arith.divf %58, %59 : vector<8x1xf32>
      %61 = vector.broadcast %60 : vector<8x1xf32> to vector<8x32xf32>
      %62 = arith.subf %54, %61 : vector<8x32xf32>
      %63 = arith.mulf %62, %62 : vector<8x32xf32>
      %cst_40 = arith.constant dense<0.000000e+00> : vector<8xf32>
      %64 = vector.multi_reduction <add>, %63, %cst_40 [1] : vector<8x32xf32> to vector<8xf32>
      %65 = vector.shape_cast %64 : vector<8xf32> to vector<8x1xf32>
      %cst_41 = arith.constant 3.200000e+01 : f32
      %66 = vector.broadcast %cst_41 : f32 to vector<8x1xf32>
      %67 = arith.divf %65, %66 : vector<8x1xf32>
      %68 = vector.broadcast %60 : vector<8x1xf32> to vector<8x32xf32>
      %69 = arith.subf %54, %68 : vector<8x32xf32>
      %cst_42 = arith.constant 9.99999974E-6 : f32
      %70 = vector.broadcast %cst_42 : f32 to vector<8x1xf32>
      %71 = arith.addf %67, %70 : vector<8x1xf32>
      %72 = math.rsqrt %71 : vector<8x1xf32>
      %73 = vector.broadcast %72 : vector<8x1xf32> to vector<8x32xf32>
      %74 = arith.mulf %69, %73 : vector<8x32xf32>
      %75 = vector.broadcast %55 : vector<1x32xf32> to vector<8x32xf32>
      %76 = arith.mulf %74, %75 : vector<8x32xf32>
      %77 = vector.broadcast %56 : vector<1x32xf32> to vector<8x32xf32>
      %78 = arith.addf %76, %77 : vector<8x32xf32>
      %c0_43 = arith.constant 0 : index
      %c0_44 = arith.constant 0 : index
      %79 = vector.load %arg17[%c0_43, %c0_44] : memref<32x128xf32, #tpu.memory_space<vmem>>, vector<32x128xf32>
      %cst_45 = arith.constant dense<0.000000e+00> : vector<8x128xf32>
      %80 = tpu.matmul %78, %79, %cst_45 {dimension_numbers = #tpu.dot_dimension_numbers<[1], [0], [0], [1], [0, 0, 1, 1], [], []>} : vector<8x32xf32>, vector<32x128xf32>, vector<8x128xf32> -> vector<8x128xf32>
      %c0_46 = arith.constant 0 : index
      %c0_47 = arith.constant 0 : index
      %81 = vector.load %arg18[%c0_46, %c0_47] : memref<1x128xf32, #tpu.memory_space<vmem>>, vector<1x128xf32>
      %82 = vector.broadcast %81 : vector<1x128xf32> to vector<8x128xf32>
      %83 = arith.addf %80, %82 : vector<8x128xf32>
      %cst_48 = arith.constant 5.000000e-01 : f32
      %84 = vector.broadcast %cst_48 : f32 to vector<8x128xf32>
      %85 = arith.mulf %84, %83 : vector<8x128xf32>
      %cst_49 = arith.constant 0.707106769 : f32
      %86 = vector.broadcast %cst_49 : f32 to vector<8x128xf32>
      %87 = arith.mulf %83, %86 : vector<8x128xf32>
      %88 = math.absf %87 : vector<8x128xf32>
      %cst_50 = arith.constant 0.327591091 : f32
      %89 = vector.broadcast %cst_50 : f32 to vector<8x128xf32>
      %90 = arith.mulf %89, %88 : vector<8x128xf32>
      %cst_51 = arith.constant 1.000000e+00 : f32
      %91 = vector.broadcast %cst_51 : f32 to vector<8x128xf32>
      %92 = arith.addf %91, %90 : vector<8x128xf32>
      %cst_52 = arith.constant 1.000000e+00 : f32
      %93 = vector.broadcast %cst_52 : f32 to vector<8x128xf32>
      %94 = arith.divf %93, %92 : vector<8x128xf32>
      %cst_53 = arith.constant 1.06140542 : f32
      %95 = vector.broadcast %cst_53 : f32 to vector<8x128xf32>
      %96 = arith.mulf %95, %94 : vector<8x128xf32>
      %cst_54 = arith.constant -1.45315206 : f32
      %97 = vector.broadcast %cst_54 : f32 to vector<8x128xf32>
      %98 = arith.addf %96, %97 : vector<8x128xf32>
      %99 = arith.mulf %98, %94 : vector<8x128xf32>
      %cst_55 = arith.constant 1.42141378 : f32
      %100 = vector.broadcast %cst_55 : f32 to vector<8x128xf32>
      %101 = arith.addf %99, %100 : vector<8x128xf32>
      %102 = arith.mulf %101, %94 : vector<8x128xf32>
      %cst_56 = arith.constant -0.284496725 : f32
      %103 = vector.broadcast %cst_56 : f32 to vector<8x128xf32>
      %104 = arith.addf %102, %103 : vector<8x128xf32>
      %105 = arith.mulf %104, %94 : vector<8x128xf32>
      %cst_57 = arith.constant 0.254829586 : f32
      %106 = vector.broadcast %cst_57 : f32 to vector<8x128xf32>
      %107 = arith.addf %105, %106 : vector<8x128xf32>
      %108 = arith.mulf %107, %94 : vector<8x128xf32>
      %cst_58 = arith.constant 0.000000e+00 : f32
      %109 = vector.broadcast %cst_58 : f32 to vector<8x128xf32>
      %110 = arith.subf %109, %88 : vector<8x128xf32>
      %111 = arith.mulf %110, %88 : vector<8x128xf32>
      %112 = math.exp %111 : vector<8x128xf32>
      %113 = arith.mulf %108, %112 : vector<8x128xf32>
      %cst_59 = arith.constant 1.000000e+00 : f32
      %114 = vector.broadcast %cst_59 : f32 to vector<8x128xf32>
      %115 = arith.subf %114, %113 : vector<8x128xf32>
      %cst_60 = arith.constant 0.000000e+00 : f32
      %116 = vector.broadcast %cst_60 : f32 to vector<8x128xf32>
      %117 = arith.cmpf oge, %87, %116 : vector<8x128xf32>
      %cst_61 = arith.constant 0.000000e+00 : f32
      %118 = vector.broadcast %cst_61 : f32 to vector<8x128xf32>
      %119 = arith.subf %118, %115 : vector<8x128xf32>
      %120 = arith.select %117, %115, %119 : vector<8x128xi1>, vector<8x128xf32>
      %cst_62 = arith.constant 1.000000e+00 : f32
      %121 = vector.broadcast %cst_62 : f32 to vector<8x128xf32>
      %122 = arith.addf %121, %120 : vector<8x128xf32>
      %123 = arith.mulf %85, %122 : vector<8x128xf32>
      %c0_63 = arith.constant 0 : index
      %c0_64 = arith.constant 0 : index
      %124 = vector.load %arg19[%c0_63, %c0_64] : memref<128x32xf32, #tpu.memory_space<vmem>>, vector<128x32xf32>
      %cst_65 = arith.constant dense<0.000000e+00> : vector<8x32xf32>
      %125 = tpu.matmul %123, %124, %cst_65 {dimension_numbers = #tpu.dot_dimension_numbers<[1], [0], [0], [1], [0, 0, 1, 1], [], []>} : vector<8x128xf32>, vector<128x32xf32>, vector<8x32xf32> -> vector<8x32xf32>
      %c0_66 = arith.constant 0 : index
      %c0_67 = arith.constant 0 : index
      %126 = vector.load %arg20[%c0_66, %c0_67] : memref<1x32xf32, #tpu.memory_space<vmem>>, vector<1x32xf32>
      %127 = vector.broadcast %126 : vector<1x32xf32> to vector<8x32xf32>
      %128 = arith.addf %125, %127 : vector<8x32xf32>
      %129 = arith.addf %54, %128 : vector<8x32xf32>
      %c0_68 = arith.constant 0 : index
      %c0_69 = arith.constant 0 : index
      %c0_70 = arith.constant 0 : index
      %130 = vector.load %arg21[%c0_68, %c0_69, %c0_70] : memref<1x8x32xf32, #tpu.memory_space<vmem>>, vector<1x8x32xf32>
      %131 = vector.shape_cast %130 : vector<1x8x32xf32> to vector<8x32xf32>
      %132 = vector.shape_cast %129 : vector<8x32xf32> to vector<1x8x32xf32>
      tpu.vector_store %arg21[%c0_68, %c0_69, %c0_70], %132 {strides = array<i32>} : memref<1x8x32xf32, #tpu.memory_space<vmem>>, vector<1x8x32xf32>,
    } else {
    }
    return
  }
  func.func @transform_0(%arg0: i32, %arg1: i32, %arg2: i32) -> (i32, i32, i32) {
    %c0_i32 = arith.constant 0 : i32
    %c0_i32_0 = arith.constant 0 : i32
    return %arg0, %arg1, %c0_i32 : i32, i32, i32
  }
  func.func @transform_1(%arg0: i32, %arg1: i32, %arg2: i32) -> (i32, i32, i32, i32) {
    %c0_i32 = arith.constant 0 : i32
    %c0_i32_0 = arith.constant 0 : i32
    %c0_i32_1 = arith.constant 0 : i32
    %c0_i32_2 = arith.constant 0 : i32
    %c0_i32_3 = arith.constant 0 : i32
    return %c0_i32, %c0_i32_0, %c0_i32_1, %c0_i32_2 : i32, i32, i32, i32
  }
  func.func @transform_2(%arg0: i32, %arg1: i32, %arg2: i32) -> (i32, i32) {
    %c0_i32 = arith.constant 0 : i32
    %c0_i32_0 = arith.constant 0 : i32
    %c0_i32_1 = arith.constant 0 : i32
    return %c0_i32, %c0_i32_0 : i32, i32
  }
  func.func @transform_3(%arg0: i32, %arg1: i32, %arg2: i32) -> (i32, i32) {
    %c0_i32 = arith.constant 0 : i32
    %c0_i32_0 = arith.constant 0 : i32
    %c0_i32_1 = arith.constant 0 : i32
    return %c0_i32, %c0_i32_0 : i32, i32
  }
  func.func @transform_4(%arg0: i32, %arg1: i32, %arg2: i32) -> (i32, i32) {
    %c0_i32 = arith.constant 0 : i32
    %c0_i32_0 = arith.constant 0 : i32
    %c0_i32_1 = arith.constant 0 : i32
    return %c0_i32, %c0_i32_0 : i32, i32
  }
  func.func @transform_5(%arg0: i32, %arg1: i32, %arg2: i32) -> (i32, i32) {
    %c0_i32 = arith.constant 0 : i32
    %c0_i32_0 = arith.constant 0 : i32
    %c0_i32_1 = arith.constant 0 : i32
    return %c0_i32, %c0_i32_0 : i32, i32
  }
  func.func @transform_6(%arg0: i32, %arg1: i32, %arg2: i32) -> (i32, i32) {
    %c0_i32 = arith.constant 0 : i32
    %c0_i32_0 = arith.constant 0 : i32
    %c0_i32_1 = arith.constant 0 : i32
    return %c0_i32, %c0_i32_0 : i32, i32
  }
  func.func @transform_7(%arg0: i32, %arg1: i32, %arg2: i32) -> (i32, i32) {
    %c0_i32 = arith.constant 0 : i32
    %c0_i32_0 = arith.constant 0 : i32
    %c0_i32_1 = arith.constant 0 : i32
    return %c0_i32, %c0_i32_0 : i32, i32
  }
  func.func @transform_8(%arg0: i32, %arg1: i32, %arg2: i32) -> (i32, i32) {
    %c0_i32 = arith.constant 0 : i32
    %c0_i32_0 = arith.constant 0 : i32
    %c0_i32_1 = arith.constant 0 : i32
    return %c0_i32, %c0_i32_0 : i32, i32
  }
  func.func @transform_9(%arg0: i32, %arg1: i32, %arg2: i32) -> (i32, i32) {
    %c0_i32 = arith.constant 0 : i32
    %c0_i32_0 = arith.constant 0 : i32
    %c0_i32_1 = arith.constant 0 : i32
    return %c0_i32, %c0_i32_0 : i32, i32
  }
  func.func @transform_10(%arg0: i32, %arg1: i32, %arg2: i32) -> (i32, i32) {
    %c0_i32 = arith.constant 0 : i32
    %c0_i32_0 = arith.constant 0 : i32
    %c0_i32_1 = arith.constant 0 : i32
    return %c0_i32, %c0_i32_0 : i32, i32
  }
  func.func @transform_11(%arg0: i32, %arg1: i32, %arg2: i32) -> (i32, i32) {
    %c0_i32 = arith.constant 0 : i32
    %c0_i32_0 = arith.constant 0 : i32
    %c0_i32_1 = arith.constant 0 : i32
    return %c0_i32, %c0_i32_0 : i32, i32
  }
  func.func @transform_12(%arg0: i32, %arg1: i32, %arg2: i32) -> (i32, i32) {
    %c0_i32 = arith.constant 0 : i32
    %c0_i32_0 = arith.constant 0 : i32
    %c0_i32_1 = arith.constant 0 : i32
    return %c0_i32, %c0_i32_0 : i32, i32
  }
  func.func @transform_13(%arg0: i32, %arg1: i32, %arg2: i32) -> (i32, i32) {
    %c0_i32 = arith.constant 0 : i32
    %c0_i32_0 = arith.constant 0 : i32
    %c0_i32_1 = arith.constant 0 : i32
    return %c0_i32, %c0_i32_0 : i32, i32
  }
  func.func @transform_14(%arg0: i32, %arg1: i32, %arg2: i32) -> (i32, i32) {
    %c0_i32 = arith.constant 0 : i32
    %c0_i32_0 = arith.constant 0 : i32
    %c0_i32_1 = arith.constant 0 : i32
    return %c0_i32, %c0_i32_0 : i32, i32
  }
  func.func @transform_15(%arg0: i32, %arg1: i32, %arg2: i32) -> (i32, i32) {
    %c0_i32 = arith.constant 0 : i32
    %c0_i32_0 = arith.constant 0 : i32
    %c0_i32_1 = arith.constant 0 : i32
    return %c0_i32, %c0_i32_0 : i32, i32
  }
  func.func @transform_16(%arg0: i32, %arg1: i32, %arg2: i32) -> (i32, i32) {
    %c0_i32 = arith.constant 0 : i32
    %c0_i32_0 = arith.constant 0 : i32
    %c0_i32_1 = arith.constant 0 : i32
    return %c0_i32, %c0_i32_0 : i32, i32
  }
  func.func @transform_17(%arg0: i32, %arg1: i32, %arg2: i32) -> (i32, i32) {
    %c0_i32 = arith.constant 0 : i32
    %c0_i32_0 = arith.constant 0 : i32
    %c0_i32_1 = arith.constant 0 : i32
    return %c0_i32, %c0_i32_0 : i32, i32
  }
  func.func @transform_18(%arg0: i32, %arg1: i32, %arg2: i32) -> (i32, i32, i32) {
    %c0_i32 = arith.constant 0 : i32
    %c0_i32_0 = arith.constant 0 : i32
    return %arg0, %arg1, %c0_i32 : i32, i32, i32
  }
}

</mosaic_0001>

<bundles_post_ra>
// kernel: tpu_custom_call.1
= control target key start
LH: loop header
LB: loop body
LE: loop exit
PB: predicated region body
PF: predicated region fallthrough
CT: control target
= control target key end

     0   :  { %s3627_s0 = inlined_call_operand.vmem [shape: f32[2,16,32], index: 0, kind: input, shape index: {}]   ;;  %s3628_s1 = inlined_call_operand.hbm [shape: f32[2,2,1,8], index: 1, kind: input, shape index: {}]   ;;  %s3629_s2 = inlined_call_operand.vmem [shape: f32[1,32], index: 2, kind: input, shape index: {}]   ;;  %s3630_s3 = inlined_call_operand.vmem [shape: f32[1,32], index: 3, kind: input, shape index: {}]   ;;  %s3631_s4 = inlined_call_operand.vmem [shape: f32[32,32], index: 4, kind: input, shape index: {}]   ;;  %s3632_s5 = inlined_call_operand.vmem [shape: f32[1,32], index: 5, kind: input, shape index: {}]   ;;  %s3633_s6 = inlined_call_operand.vmem [shape: f32[32,32], index: 6, kind: input, shape index: {}]   ;;  %s3634_s7 = inlined_call_operand.vmem [shape: f32[1,32], index: 7, kind: input, shape index: {}]   ;;  %s3635_s8 = inlined_call_operand.vmem [shape: f32[32,32], index: 8, kind: input, shape index: {}]   ;;  %s3636_s9 = inlined_call_operand.vmem [shape: f32[1,32], index: 9, kind: input, shape index: {}]   ;;  %s3637_s10 = inlined_call_operand.vmem [shape: f32[32,32], index: 10, kind: input, shape index: {}]   ;;  %s3638_s11 = inlined_call_operand.vmem [shape: f32[1,32], index: 11, kind: input, shape index: {}]   ;;  %s3639_s12 = inlined_call_operand.vmem [shape: f32[1,32], index: 12, kind: input, shape index: {}]   ;;  %s3640_s13 = inlined_call_operand.vmem [shape: f32[1,32], index: 13, kind: input, shape index: {}]   ;;  %s3641_s14 = inlined_call_operand.hbm [shape: f32[32,128], index: 14, kind: input, shape index: {}]   ;;  %s3642_s15 = inlined_call_operand.vmem [shape: f32[1,128], index: 15, kind: input, shape index: {}]   ;;  %s3643_s16 = inlined_call_operand.vmem [shape: f32[128,32], index: 16, kind: input, shape index: {}]   ;;  %s3644_s17 = inlined_call_operand.vmem [shape: f32[1,32], index: 17, kind: input, shape index: {}]   ;;  %s3645_s18 = inlined_call_operand.hbm [shape: f32[2,16,32], index: 18, kind: output, shape index: {}]  }
   0x1   :  { %3666 = sst [smem:[#allocation30_spill]] %s3627_s0 }
   0x2   :  { %3667 = sst [smem:[#allocation31_spill]] %s3628_s1 }
   0x3   :  { %3668 = sst [smem:[#allocation32_spill]] %s3629_s2 }
   0x4   :  { %3669 = sst [smem:[#allocation33_spill]] %s3638_s11 }
   0x5   :  { %3670 = sst [smem:[#allocation34_spill]] %s3639_s12 }
   0x6   :  { %3671 = sst [smem:[#allocation35_spill]] %s3640_s13 }
   0x7   :  { %3672 = sst [smem:[#allocation36_spill]] %s3642_s15 }
   0x8   :  { %3673 = sst [smem:[#allocation37_spill]] %s3643_s16 }
   0x9   :  { %3674 = sst [smem:[#allocation38_spill]] %s3644_s17 }
   0xa   :  { %3675 = sst [smem:[#allocation39_spill]] %s3645_s18 }
   0xb   :  { %23 = vsyncpa [#allocation10], 0 }
   0xc   :  { %24 = vsyncpa [#allocation13], 0 }
   0xd   :  { %25 = vsyncpa [#allocation11], 0 }
   0xe   :  { %27 = vsyncpa [#allocation11 + $0x1], 0  ;;  %s3120_s27 = smov 0   ;;  %s3122_s28 = smov 0  }
   0xf   :  { %s3124_s29 = smov 0   ;;  %s3126_s30 = smov 0  }
  0x10   :  { %s3128_s0 = smov 0   ;;  %s3130_s19 = smov 0  }
  0x11   :  { %s3132_s1 = smov 0   ;;  %s3134_s20 = smov 0  }
  0x12   :  { %s3136_s21 = smov 0   ;;  %s3138_s22 = smov 0  }
  0x13 LB: > { %3676 = sst [smem:[#allocation18_spill]] %s2956_s27  ;;  %s2338_s2 = sadd.s32 4294967295, %s2992_s22   ;;  %s2992_s22 = sphi %s3138_s22, %s33_s22   ;;  %s2988_s21 = sphi %s3136_s21, %s3721_s21   ;;  %s2984_s20 = sphi %s3134_s20, %s3720_s20   ;;  %s2980_s1 = sphi %s3132_s1, %s3719_s1   ;;  %s2976_s19 = sphi %s3130_s19, %s3718_s19   ;;  %s2972_s0 = sphi %s3128_s0, %s3724_s0   ;;  %s2968_s30 = sphi %s3126_s30, %s3716_s30   ;;  %s2964_s29 = sphi %s3124_s29, %s3715_s29   ;;  %s2960_s28 = sphi %s3122_s28, %s3723_s28   ;;  %s2956_s27 = sphi %s3120_s27, %s3722_s27  }
  0x14   : > { %3677 = sst [smem:[#allocation19_spill]] %s2964_s29  ;;  %s2339_s23 = sadd.s32 4294967294, %s2992_s22  }
  0x15   : > { %3678 = sst [smem:[#allocation20_spill]] %s2980_s1  ;;  %s45_s24 = sadd.s32 1, %s2980_s1 }
  0x16   : > { %3679 = sst [smem:[#allocation21_spill]] %s2984_s20  ;;  %s48_s25 = sadd.s32 1, %s2984_s20 }
  0x17   : > { %3680 = sst [smem:[#allocation22_spill]] %s2988_s21  ;;  %p46_p0 = scmp.ge.s32.totalorder %s45_s24, 2 }
  0x18   : > { %3681 = sst [smem:[#allocation23_spill]] %s2992_s22  ;;  %s52_s26 = sadd.s32 1, %s2988_s21 }
  0x19   : > { %s446_s18 = sadd.s32 1, %s2964_s29  ;;  %p456_p1 = scmp.ne.s32.totalorder %s2964_s29, %s2960_s28 }
  0x1a   : > { %s3726_s24 = smov (%p46_p0, %s45_s24), 0  ;;  %s3728_s25 = smov (!%p46_p0, %s48_s25), %s2984_s20 }
  0x1b   : > { %3682 = sst [smem:[#allocation24_spill]] %s3726_s24  ;;  %p457_p2 = scmp.eq.s32.totalorder %s2338_s2, 7 }
  0x1c   : > { %p462_p3 = scmp.ne.s32.totalorder %s2960_s28, %s2956_s27  ;;  %p50_p4 = scmp.ge.s32.totalorder %s3728_s25, 2 }
  0x1d   : > { %p463_p5 = scmp.eq.s32.totalorder %s2339_s23, 7  ;;  %p3183_p6 = por %p457_p2, %p456_p1 }
  0x1e   : > { %p2340_p7 = scmp.ge.s32.totalorder %s2992_s22, 1  ;;  %s3730_s25 = smov (%p50_p4, %s3728_s25), 0 }
  0x1f   : > { %s3683_s17 = scalar_select %p3183_p6, 1, 0 }
  0x20   : > { %3685 = sst [smem:[#allocation26_spill]] %s3730_s25  ;;  %s3732_s26 = smov (!%p50_p4, %s52_s26), %s2988_s21 }
  0x21   : > { %3684 = sst [smem:[#allocation25_spill]] %s3683_s17  ;;  %s442_s1 = ssub.s32 %s2984_s20, %s3730_s25 }
  0x22   : > { %p3193_p8 = por %p463_p5, %p462_p3  ;;  %p54_p9 = scmp.ge.s32.totalorder %s3732_s26, 2 }
  0x23   : > { %p470_p10 = scmp.lt.s32.totalorder %s2992_s22, 9  ;;  %p3198_p11 = scmp.eq.s32.totalorder %s2338_s2, 0 }
  0x24   : > { %s3686_s15 = scalar_select %p3193_p8, 1, 0 }
  0x25   : > { %s3688_s24 = scalar_select %p3198_p11, 1, 0 }
  0x26   : > { %3687 = sst [smem:[#allocation27_spill]] %s3686_s15  ;;  %s3734_s26 = smov (%p54_p9, %s3732_s26), 0 }
  0x27   : > { %3689 = sst [smem:[#allocation28_spill]] %s3734_s26  ;;  %p3204_p12 = pnand %p2340_p7, %p470_p10 }
  0x28   : > { %s441_s25 = ssub.s32 %s2988_s21, %s3734_s26  ;;  %s2994_s20 = smov [#allocation9]  }
  0x29   : > { %s3690_s23 = scalar_select %p3204_p12, 1, 0 }
  0x2a   : > { %s482_s27 = sshll.u32 %s2994_s20, 4  ;;  %s443_s17 = sor.u32 %s442_s1, %s441_s25  ;;  %s483_s27 = int_to_ptr.vmem [resolvable:$true] %s482_s27 }
  0x2b   : > { %p2654_p13 = pneg %p3204_p12  ;;  %p444_p0 = scmp.eq.s32.totalorder %s443_s17, 0 }
  0x2c   : > { %s3693_s13 = sld [smem:[#allocation31_spill]] }
  0x2d   : > { %p3214_p1 = pnand %p3198_p11, %p2654_p13 }
  0x2e   : > { %s3219_s15 = scalar_select %p444_p0, %s2964_s29, %s446_s18  }
  0x2f   : > { %p2820_p3 = pneg %p3214_p1 }
  0x30   : > { %3692 = sst [smem:[#allocation29_spill]] %s3219_s15 }
  0x32   : > { %s2818_s26 = scalar_lea.hbm %s3693_s13, 64 }
  0x33   : > { %p2819_p2 = scmp.ne.s32.totalorder %s3693_s13, %s2818_s26  ;;  %p2825_p7 = scmp.lt.u32.totalorder %s2818_s26, %s3693_s13 }
  0x35   : > { %p2821_p4 = pnand %p2820_p3, %p2819_p2 }
  0x37   : > { %p2822_p5 = pneg %p2821_p4 }
  0x39   : > { %p2827_p9 = pnand %p2825_p7, %p2822_p5 }
  0x3b   : > { %2830 = shalt.err (!%p2827_p9)
}
  0x3c   : > { %s2831_s18 = scalar_lea.vmem %s483_s27, 64  ;;  %p2839_p8 = scmp.lt.s32.totalorder %s483_s27, %s483_s27 }
  0x3d   : > { %p2832_p10 = scmp.ne.s32.totalorder %s483_s27, %s2831_s18  ;;  %p2840_p6 = scmp.lt.s32.totalorder %s2831_s18, %s2831_s18 }
  0x3f   : > { %p2834_p13 = pnand %p2832_p10, %p2820_p3  ;;  %p2841_p11 = por %p2840_p6, %p2839_p8 }
  0x41   : > { %p2835_p0 = pneg %p2834_p13 }
  0x43   : > { %p2842_p12 = pnand %p2841_p11, %p2835_p0 }
  0x45   : > { %2845 = shalt.err (!%p2842_p12)
}
  0x46   : > { %s2995_s16 = smov 16   ;;  %s2996_s21 = smov 1  }
  0x47   : > { %2657 = dma.hbm_to_vmem [thread:$0]  (!%p3214_p1), %s3693_s13, 64, %s483_s27, [#allocation10], %s2995_s16, %s2995_s16, %s2996_s21  }
  0x48   : > { %s2997_s26 = smov [#allocation12]   ;;  %s2846_s15 = scalar_lea.hbm %s3641_s14, 512 }
  0x49   : > { %s531_s20 = sshll.u32 %s2997_s26, 4  ;;  %p2847_p6 = scmp.ne.s32.totalorder %s3641_s14, %s2846_s15  ;;  %s532_s20 = int_to_ptr.vmem [resolvable:$true] %s531_s20 }
  0x4a   : > { %p2853_p12 = scmp.lt.u32.totalorder %s2846_s15, %s3641_s14 }
  0x4b   : > { %p2849_p8 = pnand %p2847_p6, %p2820_p3 }
  0x4d   : > { %p2850_p11 = pneg %p2849_p8 }
  0x4f   : > { %p2855_p2 = pnand %p2853_p12, %p2850_p11 }
  0x51   : > { %2858 = shalt.err (!%p2855_p2)
}
  0x52   : > { %s2859_s27 = scalar_lea.vmem %s532_s20, 512  ;;  %p2867_p9 = scmp.lt.s32.totalorder %s532_s20, %s532_s20 }
  0x53   : > { %p2860_p4 = scmp.ne.s32.totalorder %s532_s20, %s2859_s27  ;;  %p2868_p10 = scmp.lt.s32.totalorder %s2859_s27, %s2859_s27 }
  0x55   : > { %p2862_p5 = pnand %p2860_p4, %p2820_p3  ;;  %p2869_p13 = por %p2868_p10, %p2867_p9 }
  0x57   : > { %p2863_p7 = pneg %p2862_p5 }
  0x59   : > { %p2870_p0 = pnand %p2869_p13, %p2863_p7 }
  0x5b   : > { %2873 = shalt.err (!%p2870_p0)
}
  0x5c   : > { %s2998_s29 = smov 128   ;;  %s2999_s16 = smov 8  }
  0x5d   : > { %2660 = dma.hbm_to_vmem [thread:$0]  (!%p3214_p1), %s3641_s14, 512, %s532_s20, [#allocation13], %s2998_s29, %s2998_s29, %s2999_s16  }
  0x5e   : > { %p3694_p6 = scmp.ne.s32.totalorder %s3690_s23, 0 }
  0x5f   : > { %p3695_p8 = scmp.ne.s32.totalorder (!%p3694_p6), %s3688_s24, 0 }
  0x60   : > { %567 = sbr.rel (%p3694_p6) target bundleno = 3473 (0xd91), region = 92 }
  0x67   : > { %2943 = dma.done.wait (%p3695_p8), [#allocation10], 64  }
  0x68   : > { %2945 = vsyncadd (%p3695_p8), [#allocation10], 4294967232 }
  0x69   : > { %2947 = dma.done.wait (%p3695_p8), [#allocation13], 512  }
  0x6a   : > { %2949 = vsyncadd (%p3695_p8), [#allocation13], 4294966784  ;;  %s3665_s15 = sand.u32 1, %s2960_s28   ;;  %p628_p1 = scmp.lt.s32.totalorder %s2976_s19, 1  ;;  %v3292_v1 = vld [vmem:[%s3630_s3] sm:$0x1] }
  0x6b   : > { %s3277_s23 = sshll.u32 %s3665_s15, 3  ;;  %p630_p3 = scmp.lt.s32.totalorder %s2972_s0, 1 }
  0x6c   : > { %s629_s21 = scalar_select %p628_p1, %s2976_s19, 1 }
  0x6d   : > { %s631_s22 = scalar_select %p630_p3, %s2972_s0, 1 }
  0x6e   : > { %s2348_s24 = sshll.u32 %s629_s21, 1  ;;  %s2351_s25 = sshll.u32 %s2968_s30, 3 }
  0x6f   : > { %s633_s26 = sadd.s32 %s2348_s24, %s631_s22  ;;  %s3696_s1 = sld [smem:[#allocation32_spill]] }
  0x70   : > { %s2349_s29 = sshll.u32 %s633_s26, 3  ;;  %s3697_s12 = sld [smem:[#allocation30_spill]] }
  0x71   : > { %s627_s2 = scalar_lea.vmem [#allocation14], %s3277_s23  ;;  %p2352_p11 = scmp.ne.s32.totalorder %s2968_s30, 0 }
  0x72   : > { %vm645_vm0 = vcmask (!%p2352_p11), 261120   ;;  %v674_v9 = vld [vmem:[%s3631_s4] sm:$0xff] (!%p2352_p11)  ;;  %v675_v10 = vld [vmem:[%s3631_s4 + $0x8] sm:$0xff] (!%p2352_p11)  ;;  %v676_v11 = vld [vmem:[%s3631_s4 + $0x10] sm:$0xff] (!%p2352_p11)  ;;  %v3000_v12 = vmov (!%p2352_p11), 0.0|0.0   ;;  %vm3001_vm1 = vmmov (!%p2352_p11), 0   ;;  %v661_v20 = vlaneseq (!%p2352_p11) }
  0x73   : > { %643 = sbr.rel (%p2352_p11) target bundleno = 769 (0x301), region = 104  ;;  %2590 = vmatprep.subr.bf16.mxu0 (!%p2352_p11), %v3000_v12  ;;  %v2591_v13 = vpack.c.bf16 (!%p2352_p11), %v675_v10, %v674_v9  ;;  %v677_v14 = vld [vmem:[%s3631_s4 + $0x18] sm:$0xff] (!%p2352_p11)  ;;  %v3002_v15 = vmov (!%p2352_p11), 0.0   ;;  %vm777_vm2 = vcmask (!%p2352_p11), 7168   ;;  %v3003_v16 = vmov (!%p2352_p11), -1e+30  }
  0x74   : > { %2468 = vmatprep.mubr.msk.f32.mxu0 (!%p2352_p11), %vm3001_vm1, %v3002_v15  ;;  %778 = vst.msk [vmem:[#allocation5] sm:$0xff] (!%p2352_p11), %vm777_vm2, %v3003_v16  ;;  %779 = vst.msk [vmem:[#allocation5 + $0x8] sm:$0xff] (!%p2352_p11), %vm777_vm2, %v3003_v16  ;;  %v2594_v17 = vpack.c.bf16 (!%p2352_p11), %v677_v14, %v676_v11  ;;  %v662_v22 = vshrl.u32 (!%p2352_p11), %v661_v20, 7  ;;  %vm759_vm3 = vcmask (!%p2352_p11), 64512   ;;  %v2353_v30 = vld [vmem:[%s3632_s5] ss:$0 sm:$0xff] (!%p2352_p11) }
  0x75   : > { %v3287_v0 = vld [vmem:[%s3696_s1] sm:$0x1]  ;;  %780 = vst.msk [vmem:[#allocation5 + $0x10] sm:$0xff] (!%p2352_p11), %vm777_vm2, %v3003_v16  ;;  %781 = vst.msk [vmem:[#allocation5 + $0x18] sm:$0xff] (!%p2352_p11), %vm777_vm2, %v3003_v16  ;;  %2592 = vmatpush3.bf16.msra.mxu0 (!%p2352_p11), %v2591_v13  ;;  %s3004_s16 = smov (!%p2352_p11), 104   ;;  %s3005_s11 = smov (!%p2352_p11), 120  }
  0x76   : > { %s3297_s15 = scalar_lea.vmem %s3697_s12, %s2349_s29  ;;  %782 = vst.msk [vmem:[#allocation6] sm:$0xff] (!%p2352_p11), %vm777_vm2, %v3002_v15  ;;  %783 = vst.msk [vmem:[#allocation6 + $0x8] sm:$0xff] (!%p2352_p11), %vm777_vm2, %v3002_v15  ;;  %2593 = vmatprep.subr.bf16.mxu0 (!%p2352_p11), %v3000_v12  ;;  %v663_v23 = vsub.s32 (!%p2352_p11), 0, %v662_v22  ;;  %s3006_s12 = smov (!%p2352_p11), 112  }
  0x77   : > { %v644_v2 = vld [vmem:[%s3297_s15] sm:$0xff] (!%p2352_p11)  ;;  %784 = vst.msk [vmem:[#allocation6 + $0x10] sm:$0xff] (!%p2352_p11), %vm777_vm2, %v3002_v15  ;;  %785 = vst.msk [vmem:[#allocation6 + $0x18] sm:$0xff] (!%p2352_p11), %vm777_vm2, %v3002_v15 }
  0x78   : > { %v646_v3 = vsel (!%p2352_p11), %vm645_vm0, %v644_v2, 0.0  ;;  %v664_v24 = vrot.slane (!%p2352_p11), %v3287_v0, %v663_v23  ;;  %v671_v27 = vrot.slane (!%p2352_p11), %v3292_v1, %v663_v23  ;;  %786 = vst.msk [vmem:[#allocation7] sm:$0xff] (!%p2352_p11), %vm759_vm3, %v3002_v15  ;;  %787 = vst.msk [vmem:[#allocation7 + $0x8] sm:$0xff] (!%p2352_p11), %vm759_vm3, %v3002_v15 }
  0x79   : > { %647 = vadd.xlane.f32.xlu0 (!%p2352_p11), %v646_v3  ;;  %2595 = vmatpush3.bf16.msra.mxu0 (!%p2352_p11), %v2594_v17  ;;  %788 = vst.msk [vmem:[#allocation7 + $0x10] sm:$0xff] (!%p2352_p11), %vm759_vm3, %v3002_v15  ;;  %789 = vst.msk [vmem:[#allocation7 + $0x18] sm:$0xff] (!%p2352_p11), %vm759_vm3, %v3002_v15 }
 0x106   : > { %v648_v4 = vpop.xlane.xlu0 %647 }
 0x107   : > { %v650_v5 = vmul.f32 0.03125, %v648_v4 }
 0x109   : > { %v651_v6 = vsub.f32 %v644_v2, %v650_v5 }
 0x10b   : > { %v652_v7 = vmul.f32 %v651_v6, %v651_v6 }
 0x10d   : > { %v653_v8 = vsel %vm645_vm0, %v652_v7, 0.0 }
 0x10e   : > { %654 = vadd.xlane.f32.xlu0 %v653_v8 }
 0x19b   : > { %v655_v18 = vpop.xlane.xlu0 %654 }
 0x19c   : > { %v656_v19 = vmul.f32 0.03125, %v655_v18 }
 0x19e   : > { %v657_v21 = vadd.f32 1e-05, %v656_v19 }
 0x1a0   : > { %2780 = vrsqrt.f32 %v657_v21 }
 0x1aa   : > { %v2781_v25 = vpop.eup %2780 }
 0x1ab   : > { %v659_v26 = vmul.f32 %v2781_v25, %v651_v6 }
 0x1ad   : > { %v666_v28 = vmul.f32 %v664_v24, %v659_v26 }
 0x1af   : > { %v673_v29 = vadd.f32 %v671_v27, %v666_v28 }
 0x1b1   : > { %2469 = vmatmul.mubr.msk.f32.vlgmr.msra.gmra.mrb[0].mxu0 %vm645_vm0, %v673_v29 }
 0x284   : > { %v754_v31 = vpop.f32.mrb[0].mxu0 }
 0x285   : > { %v755_v32 = vadd.f32 %v2353_v30, %v754_v31  ;;  %v2470_v33 = vpop.f32.mrb[1].mxu0 }
 0x287   : > { %v758_v34 = vmul.f32 0.35355338, %v755_v32 }
 0x289   : > { %760 = vst.msk [vmem:[#allocation2] sm:$0xff] %vm759_vm3, %v758_v34  ;;  %772 = vrot.lane.b32.xlu0 %v758_v34, %s3004_s16  ;;  %762 = vrot.lane.b32.xlu1 %v758_v34, %s3005_s11 }
 0x28d   : > { %767 = vrot.lane.b32.xlu1 %v758_v34, %s3006_s12 }
 0x2fb   : > { %v773_v35 = vpop.permute.xlu0 %772  ;;  %v763_v36 = vpop.permute.xlu1 %762 }
 0x2fc   : > { %776 = vst.msk [vmem:[#allocation2 + $0x18] sm:$0xff] %vm759_vm3, %v773_v35  ;;  %766 = vst.msk [vmem:[#allocation2 + $0x8] sm:$0xff] %vm759_vm3, %v763_v36 }
 0x2ff   : > { %v768_v37 = vpop.permute.xlu1 %767 }
 0x300   : > { %771 = vst.msk [vmem:[#allocation2 + $0x10] sm:$0xff] %vm759_vm3, %v768_v37 }
 0x301 PF: > { %p2355_p12 = scmp.ne.s32.totalorder %s2972_s0, %s2968_s30 }
 0x302   : > { %v794_v38 = vld [vmem:[%s3297_s15] sm:$0xff] (!%p2355_p12)  ;;  %vm795_vm4 = vcmask (!%p2355_p12), 261120   ;;  %v825_v46 = vld [vmem:[%s3633_s6 + $0x8] sm:$0xff] (!%p2355_p12)  ;;  %v3007_v48 = vmov (!%p2355_p12), 0.0|0.0   ;;  %v826_v51 = vld [vmem:[%s3633_s6 + $0x10] sm:$0xff] (!%p2355_p12)  ;;  %vm3008_vm5 = vmmov (!%p2355_p12), 0   ;;  %v811_v61 = vlaneseq (!%p2355_p12) }
 0x303   : > { %793 = sbr.rel (%p2355_p12) target bundleno = 1430 (0x596), region = 108  ;;  %v796_v39 = vsel (!%p2355_p12), %vm795_vm4, %v794_v38, 0.0  ;;  %v824_v45 = vld [vmem:[%s3633_s6] sm:$0xff] (!%p2355_p12)  ;;  %2596 = vmatprep.subr.bf16.mxu0 (!%p2355_p12), %v3007_v48  ;;  %2602 = vmatprep.subr.bf16.mxu1 (!%p2355_p12), %v3007_v48  ;;  %v909_v50 = vld [vmem:[%s3635_s8 + $0x8] sm:$0xff] (!%p2355_p12)  ;;  %v827_v52 = vld [vmem:[%s3633_s6 + $0x18] sm:$0xff] (!%p2355_p12)  ;;  %v3009_v56 = vmov (!%p2355_p12), 0.0  }
 0x304   : > { %797 = vadd.xlane.f32.xlu0 (!%p2355_p12), %v796_v39  ;;  %v908_v47 = vld [vmem:[%s3635_s8] sm:$0xff] (!%p2355_p12)  ;;  %v2597_v49 = vpack.c.bf16 (!%p2355_p12), %v825_v46, %v824_v45  ;;  %v910_v54 = vld [vmem:[%s3635_s8 + $0x10] sm:$0xff] (!%p2355_p12)  ;;  %v911_v55 = vld [vmem:[%s3635_s8 + $0x18] sm:$0xff] (!%p2355_p12)  ;;  %2479 = vmatprep.mubr.msk.f32.mxu0 (!%p2355_p12), %vm3008_vm5, %v3009_v56  ;;  %v2600_v57 = vpack.c.bf16 (!%p2355_p12), %v827_v52, %v826_v51  ;;  %v812_v63 = vshrl.u32 (!%p2355_p12), %v811_v61, 7  ;;  %s2360_s26 = sshll.u32 (!%p2355_p12), %s2968_s30, 5  ;;  %vm991_vm6 = vcmask (!%p2355_p12), 64512  }
 0x305   : > { %v2603_v53 = vpack.c.bf16 (!%p2355_p12), %v909_v50, %v908_v47  ;;  %2490 = vmatprep.mubr.msk.f32.mxu1 (!%p2355_p12), %vm3008_vm5, %v3009_v56  ;;  %v2606_v58 = vpack.c.bf16 (!%p2355_p12), %v911_v55, %v910_v54  ;;  %v2356_v9 = vld [vmem:[%s3634_s7] ss:$0 sm:$0xff] (!%p2355_p12)  ;;  %s3010_s27 = smov (!%p2355_p12), 112   ;;  %s3011_s29 = smov (!%p2355_p12), 120  }
 0x306   : > { %2598 = vmatpush3.bf16.msra.mxu0 (!%p2355_p12), %v2597_v49  ;;  %v813_v2 = vsub.s32 (!%p2355_p12), 0, %v812_v63  ;;  %v2358_v10 = vld [vmem:[%s3636_s9] ss:$0 sm:$0xff] (!%p2355_p12)  ;;  %s990_s16 = scalar_lea.vmem (!%p2355_p12), [#allocation3], %s2360_s26  ;;  %s993_s11 = scalar_lea.vmem (!%p2355_p12), [#allocation4], %s2360_s26 }
 0x307   : > { %2604 = vmatpush3.bf16.msra.mxu1 (!%p2355_p12), %v2603_v53  ;;  %2599 = vmatprep.subr.bf16.mxu0 (!%p2355_p12), %v3007_v48  ;;  %s3012_s12 = smov (!%p2355_p12), 104  }
 0x308   : > { %2605 = vmatprep.subr.bf16.mxu1 (!%p2355_p12), %v3007_v48  ;;  %v814_v3 = vrot.slane (!%p2355_p12), %v3287_v0, %v813_v2  ;;  %v821_v6 = vrot.slane (!%p2355_p12), %v3292_v1, %v813_v2 }
 0x30a   : > { %2601 = vmatpush3.bf16.msra.mxu0 %v2600_v57 }
 0x30b   : > { %2607 = vmatpush3.bf16.msra.mxu1 %v2606_v58 }
 0x391   : > { %v798_v40 = vpop.xlane.xlu0 %797 }
 0x392   : > { %v800_v41 = vmul.f32 0.03125, %v798_v40 }
 0x394   : > { %v801_v42 = vsub.f32 %v794_v38, %v800_v41 }
 0x396   : > { %v802_v43 = vmul.f32 %v801_v42, %v801_v42 }
 0x398   : > { %v803_v44 = vsel %vm795_vm4, %v802_v43, 0.0 }
 0x399   : > { %804 = vadd.xlane.f32.xlu0 %v803_v44 }
 0x426   : > { %v805_v59 = vpop.xlane.xlu0 %804 }
 0x427   : > { %v806_v60 = vmul.f32 0.03125, %v805_v59 }
 0x429   : > { %v807_v62 = vadd.f32 1e-05, %v806_v60 }
 0x42b   : > { %2782 = vrsqrt.f32 %v807_v62 }
 0x435   : > { %v2783_v4 = vpop.eup %2782 }
 0x436   : > { %v809_v5 = vmul.f32 %v2783_v4, %v801_v42 }
 0x438   : > { %v816_v7 = vmul.f32 %v814_v3, %v809_v5 }
 0x43a   : > { %v823_v8 = vadd.f32 %v821_v6, %v816_v7 }
 0x43c   : > { %2480 = vmatmul.mubr.msk.f32.vlgmr.msra.gmra.mrb[0].mxu0 %vm795_vm4, %v823_v8  ;;  %2491 = vmatmul.mubr.msk.f32.vlgmr.msra.gmra.mrb[0].mxu1 %vm795_vm4, %v823_v8 }
 0x50f   : > { %v904_v0 = vpop.f32.mrb[0].mxu0  ;;  %v985_v11 = vpop.f32.mrb[0].mxu1 }
 0x510   : > { %v905_v12 = vadd.f32 %v2356_v9, %v904_v0  ;;  %v986_v1 = vadd.f32 %v2358_v10, %v985_v11  ;;  %v2481_v13 = vpop.f32.mrb[1].mxu0  ;;  %v2492_v14 = vpop.f32.mrb[1].mxu1 }
 0x512   : > { %1008 = vrot.lane.b32.xlu0 %v905_v12, %s3010_s27  ;;  %996 = vrot.lane.b32.xlu1 %v905_v12, %s3011_s29  ;;  %992 = vst.msk [vmem:[%s990_s16] sm:$0xff] %vm991_vm6, %v905_v12  ;;  %994 = vst.msk [vmem:[%s993_s11] sm:$0xff] %vm991_vm6, %v986_v1 }
 0x516   : > { %1003 = vrot.lane.b32.xlu1 %v986_v1, %s3011_s29 }
 0x51a   : > { %1014 = vrot.lane.b32.xlu1 %v986_v1, %s3010_s27 }
 0x51e   : > { %1019 = vrot.lane.b32.xlu1 %v905_v12, %s3012_s12 }
 0x522   : > { %1025 = vrot.lane.b32.xlu1 %v986_v1, %s3012_s12 }
 0x584   : > { %v1009_v15 = vpop.permute.xlu0 %1008  ;;  %v997_v16 = vpop.permute.xlu1 %996 }
 0x585   : > { %2366 = vst.msk [vmem:[%s990_s16 + $0x10] sm:$0xff] %vm991_vm6, %v1009_v15  ;;  %2362 = vst.msk [vmem:[%s990_s16 + $0x8] sm:$0xff] %vm991_vm6, %v997_v16 }
 0x588   : > { %v1004_v17 = vpop.permute.xlu1 %1003 }
 0x589   : > { %2364 = vst.msk [vmem:[%s993_s11 + $0x8] sm:$0xff] %vm991_vm6, %v1004_v17 }
 0x58c   : > { %v1015_v18 = vpop.permute.xlu1 %1014 }
 0x58d   : > { %2368 = vst.msk [vmem:[%s993_s11 + $0x10] sm:$0xff] %vm991_vm6, %v1015_v18 }
 0x590   : > { %v1020_v19 = vpop.permute.xlu1 %1019 }
 0x591   : > { %2370 = vst.msk [vmem:[%s990_s16 + $0x18] sm:$0xff] %vm991_vm6, %v1020_v19 }
 0x594   : > { %v1026_v20 = vpop.permute.xlu1 %1025 }
 0x595   : > { %2372 = vst.msk [vmem:[%s993_s11 + $0x18] sm:$0xff] %vm991_vm6, %v1026_v20 }
 0x596 PF: > { %p2373_p2 = scmp.gt.s32.totalorder %s2968_s30, %s2972_s0 }
 0x597   : > { %s2374_s21 = sshll.u32 (!%p2373_p2), %s2968_s30, 5  ;;  %vm1070_vm7 = vcmask (!%p2373_p2), 64512   ;;  %v3013_v21 = vmov (!%p2373_p2), 0.0   ;;  %vm3014_vm8 = vmmov (!%p2373_p2), 0   ;;  %v1045_v24 = vld [vmem:[#allocation2] sm:$0xff] (!%p2373_p2)  ;;  %v1046_v25 = vld [vmem:[#allocation2 + $0x8] sm:$0xff] (!%p2373_p2)  ;;  %v1049_v30 = vlaneseq (!%p2373_p2) }
 0x598   : > { %1033 = sbr.rel (%p2373_p2) target bundleno = 2166 (0x876), region = 112  ;;  %2493 = vmatprep.subr.mxu0 (!%p2373_p2), %v3013_v21  ;;  %2495 = vmatprep.mubr.msk.f32.mxu0 (!%p2373_p2), %vm3014_vm8, %v3013_v21  ;;  %s1035_s22 = scalar_lea.vmem (!%p2373_p2), [#allocation3], %s2374_s21  ;;  %v1047_v28 = vld [vmem:[#allocation2 + $0x10] sm:$0xff] (!%p2373_p2)  ;;  %v1048_v29 = vld [vmem:[#allocation2 + $0x18] sm:$0xff] (!%p2373_p2)  ;;  %v1055_v34 = vstv (!%p2373_p2), %s2351_s25  ;;  %v3015_v37 = vmov (!%p2373_p2), -1e+09  }
 0x599   : > { %v1036_v22 = vld [vmem:[%s1035_s22] sm:$0xff] (!%p2373_p2)  ;;  %2498 = vmatprep.subr.mxu1 (!%p2373_p2), %v3013_v21  ;;  %v1037_v23 = vld [vmem:[%s1035_s22 + $0x8] sm:$0xff] (!%p2373_p2)  ;;  %2500 = vmatprep.mubr.msk.f32.mxu1 (!%p2373_p2), %vm3014_vm8, %v3013_v21  ;;  %v1038_v26 = vld [vmem:[%s1035_s22 + $0x10] sm:$0xff] (!%p2373_p2)  ;;  %v1050_v31 = vshrl.u32 (!%p2373_p2), %v1049_v30, 7  ;;  %v1054_v32 = vand.u32 (!%p2373_p2), 127, %v1049_v30  ;;  %s3698_s24 = sshll.u32 (!%p2373_p2), %s2972_s0, 3 }
 0x59a   : > { %2494 = vmatpush3.xpose.msk.msra.mxu0 (!%p2373_p2), %vm1070_vm7, %v1036_v22  ;;  %2499 = vmatpush3.xpose.msk.msra.mxu1 (!%p2373_p2), %vm1070_vm7, %v1037_v23  ;;  %v1039_v27 = vld [vmem:[%s1035_s22 + $0x18] sm:$0xff] (!%p2373_p2)  ;;  %v1051_v33 = vstv (!%p2373_p2), %s3698_s24  ;;  %s2375_s26 = sshll.u32 (!%p2373_p2), %s2976_s19, 1  ;;  %v3016_v57 = vmov (!%p2373_p2), 0   ;;  %v1375_v58 = vld [vmem:[#allocation5] sm:$0xff] (!%p2373_p2)  ;;  %vm1463_vm10 = vcmask (!%p2373_p2), 7168   ;;  %v3419_v61 = vld [vmem:[#allocation5 + $0x8] sm:$0xff] (!%p2373_p2) }
 0x59b   : > { %2503 = vmatprep.subr.mxu0 (!%p2373_p2), %v3013_v21  ;;  %2508 = vmatprep.subr.mxu1 (!%p2373_p2), %v3013_v21  ;;  %v1052_v35 = vadd.s32 (!%p2373_p2), %v1051_v33, %v1050_v31  ;;  %v1056_v36 = vadd.s32 (!%p2373_p2), %v1055_v34, %v1054_v32  ;;  %s1060_s20 = sadd.s32 (!%p2373_p2), %s2968_s30, %s2375_s26  ;;  %v1377_v62 = vld [vmem:[#allocation5 + $0x10] sm:$0xff] (!%p2373_p2)  ;;  %v3423_v7 = vld [vmem:[#allocation5 + $0x18] sm:$0xff] (!%p2373_p2)  ;;  %s3433_s25 = scalar_lea.vmem (!%p2373_p2), [#allocation4], %s2374_s21 }
 0x59c   : > { %s1061_s17 = scalar_lea.vmem (!%p2373_p2), [#allocation9], %s1060_s20  ;;  %2784 = vset.pattern.permute.xlu0 (!%p2373_p2), %v3016_v57  ;;  %2785 = vset.pattern.permute.xlu1 (!%p2373_p2), %v3016_v57  ;;  %v1041_v12 = vld [vmem:[%s3433_s25] sm:$0xff] (!%p2373_p2)  ;;  %v1042_v13 = vld [vmem:[%s3433_s25 + $0x8] sm:$0xff] (!%p2373_p2)  ;;  %v1044_v30 = vld [vmem:[%s3433_s25 + $0x18] sm:$0xff] (!%p2373_p2) }
 0x59d   : > { %2496 = vmatmul.mubr.msk.f32.vlgmr.msra.gmra.mrb[0].mxu0 (!%p2373_p2), %vm1070_vm7, %v1045_v24  ;;  %2501 = vmatmul.mubr.msk.f32.vlgmr.msra.gmra.mrb[0].mxu1 (!%p2373_p2), %vm1070_vm7, %v1046_v25  ;;  %vm1057_vm9 = vcmp.le.s32.totalorder (!%p2373_p2), %v1056_v36, %v1052_v35  ;;  %v2376_v39 = vld [vmem:[%s1061_s17] ss:$0 sm:$0xff] (!%p2373_p2) }
 0x59e   : > { %2504 = vmatpush3.xpose.msk.msra.mxu0 (!%p2373_p2), %vm1070_vm7, %v1038_v26  ;;  %2505 = vmatprep.mubr.msk.f32.mxu0 (!%p2373_p2), %vm3014_vm8, %v3013_v21  ;;  %v1058_v38 = vsel (!%p2373_p2), %vm1057_vm9, 0.0, %v3015_v37  ;;  %v1043_v26 = vld [vmem:[%s3433_s25 + $0x10] sm:$0xff] (!%p2373_p2) }
 0x59f   : > { %2509 = vmatpush3.xpose.msk.msra.mxu1 %vm1070_vm7, %v1039_v27  ;;  %2510 = vmatprep.mubr.msk.f32.mxu1 %vm3014_vm8, %v3013_v21  ;;  %v1069_v40 = vadd.f32 %v2376_v39, %v1058_v38 }
 0x5a0   : > { %2513 = vmatprep.subr.mxu0 %v3013_v21  ;;  %2518 = vmatprep.subr.mxu1 %v3013_v21 }
 0x5a1   : > { %2506 = vmatmul.mubr.msk.f32.vlgmr.msra.gmra.mrb[2].mxu0 %vm1070_vm7, %v1047_v28 }
 0x5a2   : > { %2511 = vmatmul.mubr.msk.f32.vlgmr.msra.gmra.mrb[2].mxu1 %vm1070_vm7, %v1048_v29  ;;  %2515 = vmatprep.mubr.msk.f32.mxu0 %vm3014_vm8, %v3013_v21 }
 0x5a3   : > { %2520 = vmatprep.mubr.msk.f32.mxu1 %vm3014_vm8, %v3013_v21  ;;  %2514 = vmatpush3.msra.mxu0 %v1041_v12 }
 0x5a4   : > { %2523 = vmatprep.subr.mxu0 %v3013_v21  ;;  %2519 = vmatpush3.msra.mxu1 %v1042_v13 }
 0x5a5   : > { %2528 = vmatprep.subr.mxu1 %v3013_v21 }
 0x670   : > { %v1143_v41 = vpop.f32.mrb[0].mxu0  ;;  %v1219_v42 = vpop.f32.mrb[0].mxu1 }
 0x671   : > { %v1144_v43 = vadd.f32 %v1143_v41, %v1069_v40  ;;  %v2497_v44 = vpop.f32.mrb[1].mxu0  ;;  %v1220_v45 = vadd.f32 %v1219_v42, %v1069_v40  ;;  %v2502_v46 = vpop.f32.mrb[1].mxu1 }
 0x672   : > { %v1440_v46 = vld [vmem:[#allocation6 + $0x8] sm:$0xff] }
 0x673   : > { %v1379_v47 = vsel %vm1070_vm7, %v1144_v43, -inf  ;;  %v1382_v50 = vsel %vm1070_vm7, %v1220_v45, -inf }
 0x674   : > { %1380 = vmax.xlane.f32.xlu0 %v1379_v47  ;;  %v1295_v48 = vpop.f32.mrb[2].mxu0 }
 0x675   : > { %v1296_v49 = vadd.f32 %v1295_v48, %v1069_v40  ;;  %v2507_v51 = vpop.f32.mrb[3].mxu0  ;;  %v1371_v52 = vpop.f32.mrb[2].mxu1 }
 0x676   : > { %v1372_v53 = vadd.f32 %v1371_v52, %v1069_v40  ;;  %v2512_v54 = vpop.f32.mrb[3].mxu1  ;;  %v1441_v52 = vld [vmem:[#allocation6 + $0x10] sm:$0xff] }
 0x677   : > { %v1385_v55 = vsel %vm1070_vm7, %v1296_v49, -inf }
 0x678   : > { %1383 = vmax.xlane.f32.xlu0 %v1382_v50  ;;  %1386 = vmax.xlane.f32.xlu1 %v1385_v55  ;;  %v1388_v56 = vsel %vm1070_vm7, %v1372_v53, -inf  ;;  %v1442_v55 = vld [vmem:[#allocation6 + $0x18] sm:$0xff] }
 0x67c   : > { %1389 = vmax.xlane.f32.xlu1 %v1388_v56 }
 0x701   : > { %v1381_v59 = vpop.xlane.xlu0 %1380 }
 0x702   : > { %v1391_v60 = vmax.f32 %v1375_v58, %v1381_v59 }
 0x704   : > { %v1395_v63 = vsub.f32 %v1375_v58, %v1391_v60  ;;  %1796 = vst.msk [vmem:[#allocation5] sm:$0xff] %vm1463_vm10, %v1391_v60  ;;  %1409 = vperm.xlu0 %2784, %v1391_v60   ;;  %v1468_v60 = vld [vmem:[#allocation7] sm:$0xff] }
 0x705   : > { %v1384_v2 = vpop.xlane.xlu0 %1383  ;;  %v1387_v3 = vpop.xlane.xlu1 %1386 }
 0x706   : > { %v1399_v4 = vmul.f32 1.442695, %v1395_v63  ;;  %v1392_v5 = vmax.f32 %v3419_v61, %v1384_v2  ;;  %v1393_v6 = vmax.f32 %v1377_v62, %v1387_v3 }
 0x708   : > { %2786 = vpow2.f32 %v1399_v4  ;;  %v1396_v8 = vsub.f32 %v3419_v61, %v1392_v5  ;;  %1797 = vst.msk [vmem:[#allocation5 + $0x8] sm:$0xff] %vm1463_vm10, %v1392_v5  ;;  %1414 = vperm.xlu1 %2785, %v1392_v5   ;;  %v1397_v9 = vsub.f32 %v1377_v62, %v1393_v6  ;;  %1798 = vst.msk [vmem:[#allocation5 + $0x10] sm:$0xff] %vm1463_vm10, %v1393_v6  ;;  %v1469_v62 = vld [vmem:[#allocation7 + $0x8] sm:$0xff] }
 0x709   : > { %v1390_v10 = vpop.xlane.xlu1 %1389 }
 0x70a   : > { %v1394_v0 = vmax.f32 %v3423_v7, %v1390_v10  ;;  %v1403_v32 = vmul.f32 1.442695, %v1397_v9  ;;  %v1401_v36 = vmul.f32 1.442695, %v1396_v8 }
 0x70c   : > { %1419 = vperm.xlu1 %2785, %v1393_v6   ;;  %v1398_v11 = vsub.f32 %v3423_v7, %v1394_v0  ;;  %1799 = vst.msk [vmem:[#allocation5 + $0x18] sm:$0xff] %vm1463_vm10, %v1394_v0  ;;  %v1470_v6 = vld [vmem:[#allocation7 + $0x10] sm:$0xff] }
 0x710   : > { %1424 = vperm.xlu1 %2785, %v1394_v0   ;;  %v1471_v0 = vld [vmem:[#allocation7 + $0x18] sm:$0xff] }
 0x712   : > { %v2787_v1 = vpop.eup %2786 }
 0x714   : > { %1474 = vperm.xlu1 %2785, %v2787_v1  }
 0x783   : > { %v1410_v14 = vpop.permute.xlu0 %1409 }
 0x784   : > { %v1427_v15 = vsub.f32 %v1144_v43, %v1410_v14  ;;  %v1439_v43 = vld [vmem:[#allocation6] sm:$0xff] }
 0x785   : > { %v1443_v44 = vmul.f32 %v2787_v1, %v1439_v43 }
 0x786   : > { %v1431_v16 = vmul.f32 1.442695, %v1427_v15 }
 0x787   : > { %v1415_v17 = vpop.permute.xlu1 %1414 }
 0x788   : > { %2788 = vpow2.f32 %v1431_v16  ;;  %v1428_v18 = vsub.f32 %v1220_v45, %v1415_v17 }
 0x78a   : > { %v1433_v19 = vmul.f32 1.442695, %v1428_v18 }
 0x78b   : > { %v1420_v20 = vpop.permute.xlu1 %1419 }
 0x78c   : > { %2790 = vpow2.f32 %v1433_v19  ;;  %v1429_v22 = vsub.f32 %v1296_v49, %v1420_v20 }
 0x78e   : > { %v1435_v23 = vmul.f32 1.442695, %v1429_v22 }
 0x78f   : > { %v1425_v24 = vpop.permute.xlu1 %1424 }
 0x790   : > { %2792 = vpow2.f32 %v1435_v23  ;;  %v1430_v25 = vsub.f32 %v1372_v53, %v1425_v24 }
 0x792   : > { %v2789_v27 = vpop.eup %2788  ;;  %v1437_v28 = vmul.f32 1.442695, %v1430_v25 }
 0x793   : > { %2516 = vmatmul.mubr.msk.f32.vlgmr.msra.gmra.mrb[4].mxu0 %vm1070_vm7, %v2789_v27  ;;  %v1447_v29 = vsel %vm1070_vm7, %v2789_v27, 0.0  ;;  %v1475_v42 = vpop.permute.xlu1 %1474 }
 0x794   : > { %2794 = vpow2.f32 %v1437_v28  ;;  %1448 = vadd.xlane.f32.xlu1 %v1447_v29  ;;  %2524 = vmatpush3.msra.mxu0 %v1043_v26  ;;  %v1492_v61 = vmul.f32 %v1475_v42, %v1468_v60 }
 0x795   : > { %2525 = vmatprep.mubr.msk.f32.mxu0 %vm3014_vm8, %v3013_v21  ;;  %2796 = vpow2.f32 %v1403_v32 }
 0x796   : > { %v2791_v31 = vpop.eup %2790  ;;  %2798 = vpow2.f32 %v1401_v36 }
 0x797   : > { %2521 = vmatmul.mubr.msk.f32.vlgmr.msra.gmra.mrb[4].mxu1 %vm1070_vm7, %v2791_v31  ;;  %v1450_v33 = vsel %vm1070_vm7, %v2791_v31, 0.0 }
 0x798   : > { %1451 = vadd.xlane.f32.xlu0 %v1450_v33  ;;  %2529 = vmatpush3.msra.mxu1 %v1044_v30 }
 0x799   : > { %2530 = vmatprep.mubr.msk.f32.mxu1 %vm3014_vm8, %v3013_v21  ;;  %v1405_v21 = vmul.f32 1.442695, %v1398_v11 }
 0x79a   : > { %v2793_v34 = vpop.eup %2792 }
 0x79b   : > { %2526 = vmatmul.mubr.msk.f32.vlgmr.msra.gmra.mrb[6].mxu0 %vm1070_vm7, %v2793_v34  ;;  %v1453_v39 = vsel %vm1070_vm7, %v2793_v34, 0.0  ;;  %2800 = vpow2.f32 %v1405_v21 }
 0x79e   : > { %v2795_v35 = vpop.eup %2794 }
 0x79f   : > { %2531 = vmatmul.mubr.msk.f32.vlgmr.msra.gmra.mrb[6].mxu1 %vm1070_vm7, %v2795_v35  ;;  %v2797_v37 = vpop.eup %2796  ;;  %v1456_v40 = vsel %vm1070_vm7, %v2795_v35, 0.0 }
 0x7a0   : > { %v2799_v38 = vpop.eup %2798  ;;  %v1445_v53 = vmul.f32 %v2797_v37, %v1441_v52 }
 0x7a1   : > { %v1444_v48 = vmul.f32 %v2799_v38, %v1440_v46 }
 0x7a5   : > { %1484 = vperm.xlu1 %2785, %v2797_v37   ;;  %v2801_v41 = vpop.eup %2800 }
 0x7a6   : > { %v1446_v57 = vmul.f32 %v2801_v41, %v1442_v55 }
 0x7ae   : > { %1479 = vperm.xlu0 %2784, %v2799_v38  }
 0x7c9   : > { %1454 = vadd.xlane.f32.xlu1 %v1453_v39 }
 0x7cd   : > { %1457 = vadd.xlane.f32.xlu1 %v1456_v40 }
 0x7de   : > { %1489 = vperm.xlu1 %2785, %v2801_v41  }
 0x821   : > { %v1449_v45 = vpop.xlane.xlu1 %1448 }
 0x822   : > { %v1459_v47 = vadd.f32 %v1449_v45, %v1443_v44 }
 0x824   : > { %1464 = vst.msk [vmem:[#allocation6] sm:$0xff] %vm1463_vm10, %v1459_v47 }
 0x825   : > { %v1452_v49 = vpop.xlane.xlu0 %1451  ;;  %v1485_v51 = vpop.permute.xlu1 %1484 }
 0x826   : > { %v1460_v50 = vadd.f32 %v1452_v49, %v1444_v48  ;;  %v1494_v10 = vmul.f32 %v1485_v51, %v1470_v6 }
 0x828   : > { %1465 = vst.msk [vmem:[#allocation6 + $0x8] sm:$0xff] %vm1463_vm10, %v1460_v50 }
 0x82d   : > { %v1480_v63 = vpop.permute.xlu0 %1479 }
 0x82e   : > { %v1493_v5 = vmul.f32 %v1480_v63, %v1469_v62 }
 0x856   : > { %v1455_v54 = vpop.xlane.xlu1 %1454 }
 0x857   : > { %v1461_v56 = vadd.f32 %v1455_v54, %v1445_v53 }
 0x859   : > { %1466 = vst.msk [vmem:[#allocation6 + $0x10] sm:$0xff] %vm1463_vm10, %v1461_v56 }
 0x85a   : > { %v1458_v58 = vpop.xlane.xlu1 %1457 }
 0x85b   : > { %v1462_v59 = vadd.f32 %v1458_v58, %v1446_v57 }
 0x85d   : > { %1467 = vst.msk [vmem:[#allocation6 + $0x18] sm:$0xff] %vm1463_vm10, %v1462_v59 }
 0x85e   : > { %v1490_v11 = vpop.permute.xlu1 %1489 }
 0x85f   : > { %v1495_v14 = vmul.f32 %v1490_v11, %v1471_v0 }
 0x866   : > { %v1565_v2 = vpop.f32.mrb[4].mxu0 }
 0x867   : > { %v1788_v3 = vadd.f32 %v1565_v2, %v1492_v61  ;;  %v2517_v4 = vpop.f32.mrb[5].mxu0 }
 0x869   : > { %1792 = vst.msk [vmem:[#allocation7] sm:$0xff] %vm1070_vm7, %v1788_v3 }
 0x86a   : > { %v1638_v7 = vpop.f32.mrb[4].mxu1 }
 0x86b   : > { %v1789_v8 = vadd.f32 %v1638_v7, %v1493_v5  ;;  %v2522_v9 = vpop.f32.mrb[5].mxu1 }
 0x86d   : > { %1793 = vst.msk [vmem:[#allocation7 + $0x8] sm:$0xff] %vm1070_vm7, %v1789_v8 }
 0x86e   : > { %v1711_v12 = vpop.f32.mrb[6].mxu0 }
 0x86f   : > { %v1790_v1 = vadd.f32 %v1711_v12, %v1494_v10  ;;  %v2527_v13 = vpop.f32.mrb[7].mxu0 }
 0x871   : > { %1794 = vst.msk [vmem:[#allocation7 + $0x10] sm:$0xff] %vm1070_vm7, %v1790_v1 }
 0x872   : > { %v1784_v15 = vpop.f32.mrb[6].mxu1 }
 0x873   : > { %v1791_v16 = vadd.f32 %v1784_v15, %v1495_v14  ;;  %v2532_v17 = vpop.f32.mrb[7].mxu1 }
 0x875   : > { %1795 = vst.msk [vmem:[#allocation7 + $0x18] sm:$0xff] %vm1070_vm7, %v1791_v16 }
 0x876 PF: > { %p2389_p4 = scmp.ne.s32.totalorder %s2968_s30, %s2972_s0 }
 0x877   : > { %v1805_v18 = vld [vmem:[#allocation6 + $0x8] sm:$0xff] (!%p2389_p4)  ;;  %v1807_v19 = vld [vmem:[#allocation6 + $0x18] sm:$0xff] (!%p2389_p4)  ;;  %v1806_v20 = vld [vmem:[#allocation6 + $0x10] sm:$0xff] (!%p2389_p4)  ;;  %v3017_v22 = vmov (!%p2389_p4), 0   ;;  %v3018_v31 = vmov (!%p2389_p4), 0.0|0.0   ;;  %vm3019_vm11 = vmmov (!%p2389_p4), 0  }
 0x878   : > { %1803 = sbr.rel (%p2389_p4) target bundleno = 3445 (0xd75), region = 116  ;;  %2802 = vset.pattern.permute.xlu0 (!%p2389_p4), %v3017_v22  ;;  %2803 = vset.pattern.permute.xlu1 (!%p2389_p4), %v3017_v22  ;;  %2804 = vrcp.f32 (!%p2389_p4), %v1805_v18  ;;  %v1804_v23 = vld [vmem:[#allocation6] sm:$0xff] (!%p2389_p4)  ;;  %v1865_v29 = vld [vmem:[%s3637_s10 + $0x8] sm:$0xff] (!%p2389_p4)  ;;  %v1866_v32 = vld [vmem:[%s3637_s10 + $0x10] sm:$0xff] (!%p2389_p4)  ;;  %v3020_v35 = vmov (!%p2389_p4), 0.0   ;;  %s3021_s21 = smov (!%p2389_p4), 8  }
 0x879   : > { %2806 = vrcp.f32 (!%p2389_p4), %v1807_v19  ;;  %v1864_v28 = vld [vmem:[%s3637_s10] sm:$0xff] (!%p2389_p4)  ;;  %2608 = vmatprep.subr.bf16.mxu1 (!%p2389_p4), %v3018_v31  ;;  %v1867_v33 = vld [vmem:[%s3637_s10 + $0x18] sm:$0xff] (!%p2389_p4)  ;;  %2620 = vmatprep.subr.bf16.mxu0 (!%p2389_p4), %v3018_v31  ;;  %v1822_v36 = vld [vmem:[#allocation7 + $0x8] sm:$0xff] (!%p2389_p4)  ;;  %vm1819_vm12 = vcmask (!%p2389_p4), 64512   ;;  %s3022_s22 = smov (!%p2389_p4), 16   ;;  %s3023_s24 = smov (!%p2389_p4), 24  }
 0x87a   : > { %2808 = vrcp.f32 (!%p2389_p4), %v1806_v20  ;;  %v2609_v30 = vpack.c.bf16 (!%p2389_p4), %v1865_v29, %v1864_v28  ;;  %v2612_v34 = vpack.c.bf16 (!%p2389_p4), %v1867_v33, %v1866_v32  ;;  %2541 = vmatprep.mubr.msk.f32.mxu1 (!%p2389_p4), %vm3019_vm11, %v3020_v35  ;;  %2587 = vmatprep.mubr.msk.f32.mxu0 (!%p2389_p4), %vm3019_vm11, %v3020_v35  ;;  %v1836_v21 = vld [vmem:[#allocation7 + $0x10] sm:$0xff] (!%p2389_p4)  ;;  %v1812_v42 = vld [vmem:[#allocation7] sm:$0xff] (!%p2389_p4)  ;;  %vm1833_vm13 = vcmask (!%p2389_p4), 130112   ;;  %s3699_s17 = sld [smem:[#allocation33_spill]] (!%p2389_p4)  ;;  %s3700_s30 = sld [smem:[#allocation34_spill]] (!%p2389_p4) }
 0x87b   : > { %2810 = vrcp.f32 (!%p2389_p4), %v1804_v23  ;;  %vm1847_vm14 = vcmask (!%p2389_p4), 195712   ;;  %vm1861_vm15 = vcmask (!%p2389_p4), 261312   ;;  %vm1875_vm0 = vcmask (!%p2389_p4), 261120   ;;  %v1949_v53 = vld [vmem:[%s3297_s15] sm:$0xff] (!%p2389_p4)  ;;  %v1981_v63 = vld [vmem:[#allocation12] sm:$0xff] (!%p2389_p4)  ;;  %v1982_v2 = vld [vmem:[#allocation12 + $0x8] sm:$0xff] (!%p2389_p4) }
 0x87c   : > { %2610 = vmatpush3.bf16.msra.mxu1 (!%p2389_p4), %v2609_v30  ;;  %v1850_v38 = vld [vmem:[#allocation7 + $0x18] sm:$0xff] (!%p2389_p4)  ;;  %v2615_v3 = vpack.c.bf16 (!%p2389_p4), %v1982_v2, %v1981_v63  ;;  %v1984_v5 = vld [vmem:[#allocation12 + $0x18] sm:$0xff] (!%p2389_p4)  ;;  %s3701_s27 = sld [smem:[#allocation35_spill]] (!%p2389_p4)  ;;  %s3702_s11 = sld [smem:[#allocation37_spill]] (!%p2389_p4) }
 0x87d   : > { %2611 = vmatprep.subr.bf16.mxu1 (!%p2389_p4), %v3018_v31  ;;  %v1983_v4 = vld [vmem:[#allocation12 + $0x10] sm:$0xff] (!%p2389_p4)  ;;  %s3704_s20 = sld [smem:[#allocation38_spill]] (!%p2389_p4) }
 0x87e   : > { %v2618_v6 = vpack.c.bf16 (!%p2389_p4), %v1984_v5, %v1983_v4 }
 0x880   : > { %2613 = vmatpush3.bf16.msra.mxu1 %v2612_v34  ;;  %v2390_v51 = vld [vmem:[%s3699_s17] ss:$0 sm:$0xff] }
 0x881   : > { %2614 = vmatprep.subr.bf16.mxu1 %v3018_v31  ;;  %v2392_v0 = vld [vmem:[%s3700_s30] ss:$0 sm:$0xff] }
 0x882   : > { %v2805_v24 = vpop.eup %2804  ;;  %v2393_v12 = vld [vmem:[%s3701_s27] ss:$0 sm:$0xff]  ;;  %v2093_v15 = vld [vmem:[%s3702_s11 + $0x8] sm:$0xff]  ;;  %v2094_v16 = vld [vmem:[%s3702_s11 + $0x10] sm:$0xff] }
 0x883   : > { %v2807_v25 = vpop.eup %2806  ;;  %1825 = vperm.xlu0 %2802, %v2805_v24   ;;  %v2092_v14 = vld [vmem:[%s3702_s11] sm:$0xff]  ;;  %v2095_v18 = vld [vmem:[%s3702_s11 + $0x18] sm:$0xff]  ;;  %v2097_v22 = vld [vmem:[%s3702_s11 + $0x28] sm:$0xff] }
 0x884   : > { %v2809_v26 = vpop.eup %2808  ;;  %1853 = vperm.xlu1 %2803, %v2807_v25   ;;  %v2621_v17 = vpack.c.bf16 %v2093_v15, %v2092_v14  ;;  %v2624_v19 = vpack.c.bf16 %v2095_v18, %v2094_v16  ;;  %v2096_v20 = vld [vmem:[%s3702_s11 + $0x20] sm:$0xff]  ;;  %v2098_v24 = vld [vmem:[%s3702_s11 + $0x30] sm:$0xff]  ;;  %v2099_v25 = vld [vmem:[%s3702_s11 + $0x38] sm:$0xff] }
 0x885   : > { %v2811_v27 = vpop.eup %2810  ;;  %v2627_v23 = vpack.c.bf16 %v2097_v22, %v2096_v20  ;;  %v2101_v28 = vld [vmem:[%s3702_s11 + $0x48] sm:$0xff]  ;;  %v2102_v30 = vld [vmem:[%s3702_s11 + $0x50] sm:$0xff]  ;;  %v2103_v32 = vld [vmem:[%s3702_s11 + $0x58] sm:$0xff] }
 0x886   : > { %2622 = vmatpush3.bf16.msra.mxu0 %v2621_v17  ;;  %v2636_v33 = vpack.c.bf16 %v2103_v32, %v2102_v30  ;;  %v2104_v34 = vld [vmem:[%s3702_s11 + $0x60] sm:$0xff] }
 0x887   : > { %1839 = vperm.xlu0 %2802, %v2809_v26   ;;  %2623 = vmatprep.subr.bf16.mxu0 %v3018_v31  ;;  %v2630_v26 = vpack.c.bf16 %v2099_v25, %v2098_v24 }
 0x888   : > { %1815 = vperm.xlu1 %2803, %v2811_v27   ;;  %v2100_v27 = vld [vmem:[%s3702_s11 + $0x40] sm:$0xff] }
 0x889   : > { %v2633_v29 = vpack.c.bf16 %v2101_v28, %v2100_v27 }
 0x88a   : > { %2625 = vmatpush3.bf16.msra.mxu0 %v2624_v19 }
 0x88b   : > { %2626 = vmatprep.subr.bf16.mxu0 %v3018_v31 }
 0x88e   : > { %2628 = vmatpush3.bf16.msra.mxu0 %v2627_v23 }
 0x88f   : > { %2629 = vmatprep.subr.bf16.mxu0 %v3018_v31 }
 0x892   : > { %2631 = vmatpush3.bf16.msra.mxu0 %v2630_v26 }
 0x893   : > { %2632 = vmatprep.subr.bf16.mxu0 %v3018_v31 }
 0x896   : > { %2634 = vmatpush3.bf16.msra.mxu0 %v2633_v29 }
 0x897   : > { %2635 = vmatprep.subr.bf16.mxu0 %v3018_v31 }
 0x89a   : > { %2637 = vmatpush3.bf16.msra.mxu0 %v2636_v33 }
 0x89b   : > { %2638 = vmatprep.subr.bf16.mxu0 %v3018_v31 }
 0x902   : > { %v1826_v37 = vpop.permute.xlu0 %1825 }
 0x903   : > { %v1828_v39 = vmul.f32 %v1826_v37, %v1822_v36  ;;  %v1854_v40 = vpop.permute.xlu1 %1853  ;;  %v2106_v37 = vld [vmem:[%s3702_s11 + $0x70] sm:$0xff] }
 0x904   : > { %v1856_v41 = vmul.f32 %v1854_v40, %v1850_v38  ;;  %v2107_v38 = vld [vmem:[%s3702_s11 + $0x78] sm:$0xff] }
 0x905   : > { %1830 = vrot.lane.b32.xlu0 %v1828_v39, %s3021_s21  ;;  %v2642_v39 = vpack.c.bf16 %v2107_v38, %v2106_v37 }
 0x906   : > { %v1840_v43 = vpop.permute.xlu0 %1839 }
 0x907   : > { %v1842_v44 = vmul.f32 %v1840_v43, %v1836_v21  ;;  %v1816_v45 = vpop.permute.xlu1 %1815 }
 0x908   : > { %v1818_v46 = vmul.f32 %v1816_v45, %v1812_v42 }
 0x909   : > { %1844 = vrot.lane.b32.xlu1 %v1842_v44, %s3022_s22  ;;  %1858 = vrot.lane.b32.xlu0 %v1856_v41, %s3023_s24  ;;  %s3703_s22 = sld [smem:[#allocation36_spill]] }
 0x90a   : > { %1820 = vst.msk [vmem:[#allocation8] sm:$0xff] %vm1819_vm12, %v1818_v46 }
 0x90f   : > { %v2394_v40 = vld [vmem:[%s3703_s22] ss:$0 sm:$0xff] }
 0x977   : > { %v1831_v47 = vpop.permute.xlu0 %1830 }
 0x978   : > { %1834 = vst.msk [vmem:[#allocation8] sm:$0xff] %vm1833_vm13, %v1831_v47 }
 0x97b   : > { %v1845_v48 = vpop.permute.xlu1 %1844  ;;  %v1859_v49 = vpop.permute.xlu0 %1858 }
 0x97c   : > { %1848 = vst.msk [vmem:[#allocation8] sm:$0xff] %vm1847_vm14, %v1845_v48 }
 0x97d   : > { %1862 = vst.msk [vmem:[#allocation8] sm:$0xff] %vm1861_vm15, %v1859_v49 }
 0x984   : > { %v1863_v50 = vld [vmem:[#allocation8] sm:$0xff] }
 0x985   : > { %2542 = vmatmul.mubr.msk.f32.vlgmr.msra.gmra.mrb[0].mxu1 %vm1875_vm0, %v1863_v50 }
 0x986   : > { %2552 = vmatprep.mubr.msk.f32.mxu1 %vm3019_vm11, %v3020_v35  ;;  %2616 = vmatpush3.bf16.msra.mxu1 %v2615_v3  ;;  %v2105_v35 = vld [vmem:[%s3702_s11 + $0x68] sm:$0xff] }
 0x987   : > { %2617 = vmatprep.subr.bf16.mxu1 %v3018_v31  ;;  %v2639_v36 = vpack.c.bf16 %v2105_v35, %v2104_v34 }
 0x989   : > { %2640 = vmatpush3.bf16.msra.mxu0 %v2639_v36 }
 0x98a   : > { %2619 = vmatpush3.bf16.msra.mxu1 %v2618_v6  ;;  %2641 = vmatprep.subr.bf16.mxu0 %v3018_v31  ;;  %v2396_v6 = vld [vmem:[%s3704_s20] ss:$0 sm:$0xff] }
 0x98d   : > { %2643 = vmatpush3.bf16.msra.mxu0 %v2642_v39 }
 0xa58   : > { %v1945_v52 = vpop.f32.mrb[0].mxu1 }
 0xa59   : > { %v1946_v54 = vadd.f32 %v2390_v51, %v1945_v52  ;;  %v2543_v55 = vpop.f32.mrb[1].mxu1 }
 0xa5b   : > { %v3487_v56 = vadd.f32 %v1949_v53, %v1946_v54 }
 0xa5d   : > { %v1953_v57 = vsel %vm1875_vm0, %v3487_v56, 0.0 }
 0xa5e   : > { %1954 = vadd.xlane.f32.xlu1 %v1953_v57 }
 0xaeb   : > { %v1955_v58 = vpop.xlane.xlu1 %1954 }
 0xaec   : > { %v1957_v59 = vmul.f32 0.03125, %v1955_v58 }
 0xaee   : > { %v1958_v60 = vsub.f32 %v3487_v56, %v1957_v59 }
 0xaf0   : > { %v1959_v61 = vmul.f32 %v1958_v60, %v1958_v60 }
 0xaf2   : > { %v1960_v62 = vsel %vm1875_vm0, %v1959_v61, 0.0 }
 0xaf3   : > { %1961 = vadd.xlane.f32.xlu0 %v1960_v62 }
 0xb80   : > { %v1962_v7 = vpop.xlane.xlu0 %1961 }
 0xb81   : > { %v1963_v8 = vmul.f32 0.03125, %v1962_v7 }
 0xb83   : > { %v1964_v9 = vadd.f32 1e-05, %v1963_v8 }
 0xb85   : > { %2812 = vrsqrt.f32 %v1964_v9 }
 0xb8f   : > { %v2813_v10 = vpop.eup %2812 }
 0xb90   : > { %v1966_v11 = vmul.f32 %v2813_v10, %v1958_v60 }
 0xb92   : > { %v1973_v1 = vmul.f32 %v2392_v0, %v1966_v11 }
 0xb94   : > { %v1980_v13 = vadd.f32 %v2393_v12, %v1973_v1 }
 0xb96   : > { %2553 = vmatmul.mubr.msk.f32.vlgmr.msra.gmra.mrb[2].mxu1 %vm1875_vm0, %v1980_v13 }
 0xc69   : > { %v2061_v21 = vpop.f32.mrb[2].mxu1 }
 0xc6a   : > { %v2062_v41 = vadd.f32 %v2394_v40, %v2061_v21  ;;  %v2554_v42 = vpop.f32.mrb[3].mxu1 }
 0xc6c   : > { %v2066_v43 = vmul.f32 0.70710677, %v2062_v41  ;;  %v2065_v3 = vmul.f32 0.5, %v2062_v41 }
 0xc6e   : > { %v2067_v44 = vand.u32 2147483647, %v2066_v43  ;;  %vm2087_vm1 = vcmp.ge.f32.partialorder %v2066_v43, 0.0 }
 0xc70   : > { %v2068_v45 = vmul.f32 0.3275911, %v2067_v44  ;;  %v2081_v47 = vsub.f32 0.0, %v2067_v44 }
 0xc72   : > { %v2069_v46 = vadd.f32 1.0, %v2068_v45  ;;  %v2082_v49 = vmul.f32 %v2081_v47, %v2067_v44 }
 0xc74   : > { %2814 = vrcp.f32 %v2069_v46  ;;  %v2083_v52 = vmul.f32 1.442695, %v2082_v49 }
 0xc76   : > { %2816 = vpow2.f32 %v2083_v52 }
 0xc7e   : > { %v2815_v48 = vpop.eup %2814 }
 0xc7f   : > { %v2072_v50 = vmul.f32 1.0614054, %v2815_v48 }
 0xc80   : > { %v2817_v60 = vpop.eup %2816 }
 0xc81   : > { %v2073_v51 = vadd.f32 -1.4531521, %v2072_v50 }
 0xc83   : > { %v2074_v31 = vmul.f32 %v2815_v48, %v2073_v51 }
 0xc85   : > { %v2075_v53 = vadd.f32 1.4214138, %v2074_v31 }
 0xc87   : > { %v2076_v54 = vmul.f32 %v2815_v48, %v2075_v53 }
 0xc89   : > { %v2077_v55 = vadd.f32 -0.28449672, %v2076_v54 }
 0xc8b   : > { %v2078_v57 = vmul.f32 %v2815_v48, %v2077_v55 }
 0xc8d   : > { %v2079_v58 = vadd.f32 0.2548296, %v2078_v57 }
 0xc8f   : > { %v2080_v59 = vmul.f32 %v2815_v48, %v2079_v58 }
 0xc91   : > { %v2085_v61 = vmul.f32 %v2817_v60, %v2080_v59 }
 0xc93   : > { %v2086_v62 = vsub.f32 1.0, %v2085_v61 }
 0xc95   : > { %v2088_v63 = vsub.f32 0.0, %v2086_v62 }
 0xc97   : > { %v2089_v2 = vsel %vm2087_vm1, %v2086_v62, %v2088_v63 }
 0xc98   : > { %v2090_v4 = vadd.f32 1.0, %v2089_v2 }
 0xc9a   : > { %v2091_v5 = vmul.f32 %v2090_v4, %v2065_v3 }
 0xc9c   : > { %2588 = vmatmul.mubr.f32.vlgmr.msra.gmra.mrb[0].mxu0 %v2091_v5 }
 0xd6f   : > { %v2181_v7 = vpop.f32.mrb[0].mxu0 }
 0xd70   : > { %v2182_v8 = vadd.f32 %v2396_v6, %v2181_v7  ;;  %v2589_v9 = vpop.f32.mrb[1].mxu0 }
 0xd72   : > { %v2185_v10 = vadd.f32 %v2182_v8, %v3487_v56 }
 0xd74   : > { %2186 = vst.msk [vmem:[%s627_s2] sm:$0xff] %vm1875_vm0, %v2185_v10 }
 0xd75 PF: > { %s3705_s17 = sld [smem:[#allocation25_spill]]  ;;  %s2398_s15 = sshll.u32 %s2976_s19, 1 }
 0xd76   : > { %s2199_s25 = sadd.s32 %s2972_s0, %s2398_s15  ;;  %s2203_s30 = sshll.u32 %s627_s2, 4  ;;  %s3570_s30 = int_to_ptr.vmem [resolvable:$true] %s2203_s30 }
 0xd77   : > { %s2399_s1 = sshll.u32 %s2199_s25, 7  ;;  %s3706_s29 = sld [smem:[#allocation39_spill]] }
 0xd78   : > { %s3708_s21 = sand.u32 1, %s2960_s28   ;;  %s2874_s24 = scalar_lea.vmem %s3570_s30, 128 }
 0xd79   : > { %s2188_s22 = scalar_lea.sflag [#allocation11], %s3708_s21  ;;  %p2875_p5 = scmp.ne.s32.totalorder %s3570_s30, %s2874_s24 }
 0xd7a   : > { %s3024_s0 = smov [#allocation14]  }
 0xd7b   : > { %p3709_p7 = scmp.ne.s32.totalorder %s3705_s17, 0  ;;  %s2878_s19 = sshll.u32 %s3024_s0, 4  ;;  %s2879_s19 = int_to_ptr.vmem [resolvable:$false] %s2878_s19 }
 0xd7c   : > { %s2880_s23 = scalar_lea.vmem %s2879_s19, 256  ;;  %p2881_p13 = scmp.lt.s32.totalorder %s3570_s30, %s2879_s19 }
 0xd7d   : > { %s3707_s16 = smov %s3706_s29  ;;  %s2201_s12 = scalar_lea.hbm %s3706_s29, %s2399_s1 }
 0xd7e   : > { %p2876_p9 = pnand %p2875_p5, %p3709_p7  ;;  %p2882_p0 = scmp.lt.s32.totalorder %s2880_s23, %s2874_s24 }
 0xd80   : > { %p2877_p10 = pneg %p2876_p9  ;;  %p2883_p6 = por %p2882_p0, %p2881_p13 }
 0xd82   : > { %p2884_p8 = pnand %p2883_p6, %p2877_p10 }
 0xd84   : > { %2887 = shalt.err (!%p2884_p8)
}
 0xd85   : > { %s2888_s2 = scalar_lea.hbm %s2201_s12, 128  ;;  %s2892_s15 = scalar_lea.hbm %s3707_s16, 512 }
 0xd86   : > { %p2889_p1 = scmp.ne.s32.totalorder %s2201_s12, %s2888_s2  ;;  %p2893_p12 = scmp.lt.u32.totalorder %s2201_s12, %s3707_s16 }
 0xd87   : > { %p2894_p2 = scmp.lt.u32.totalorder %s2892_s15, %s2888_s2  ;;  %p2896_p5 = scmp.lt.u32.totalorder %s2888_s2, %s2201_s12 }
 0xd88   : > { %p2890_p3 = pnand %p2889_p1, %p3709_p7 }
 0xd89   : > { %p2895_p4 = por %p2894_p2, %p2893_p12 }
 0xd8a   : > { %p2891_p11 = pneg %p2890_p3 }
 0xd8b   : > { %p2897_p9 = por %p2896_p5, %p2895_p4 }
 0xd8d   : > { %p2898_p10 = pnand %p2897_p9, %p2891_p11 }
 0xd8f   : > { %2901 = shalt.err (!%p2898_p10)
}
 0xd90   : > { %2652 = dma.vmem_to_hbm [thread:$0]  (%p3709_p7), %s3570_s30, 128, %s2201_s12, %s2188_s22  }
 0xd91 PF: > { %s3710_s18 = sld [smem:[#allocation23_spill]]  ;;  %s3711_s27 = sld [smem:[#allocation18_spill]] }
 0xd92   : > { %s3712_s29 = sld [smem:[#allocation27_spill]] }
 0xd97   : > { %p2669_p13 = scmp.ge.s32.totalorder %s3710_s18, 2  ;;  %s2215_s21 = sand.u32 1, %s3711_s27  }
 0xd98   : > { %p3713_p0 = scmp.ne.s32.totalorder %s3712_s29, 0  ;;  %s2216_s24 = scalar_lea.sflag [#allocation11], %s2215_s21 }
 0xd9a   : > { %p2662_p6 = pnand %p2669_p13, %p3713_p0 }
 0xd9c   : > { %2951 = dma.done.wait (!%p2662_p6), %s2216_s24, 128  }
 0xd9d   : > { %2953 = vsyncadd (!%p2662_p6), %s2216_s24, 4294967168  ;;  %s33_s22 = sadd.s32 1, %s3710_s18   ;;  %s3714_s0 = sld [smem:[#allocation19_spill]] }
 0xd9e   : > { %p30_p8 = scmp.ge.s32.totalorder %s33_s22, 10   ;;  %s3715_s29 = sld [smem:[#allocation29_spill]] }
 0xd9f   : > { %s3716_s30 = sld [smem:[#allocation20_spill]]  ;;  %s3717_s17 = sld [smem:[#allocation21_spill]] }
 0xda0   : > { %s3718_s19 = sld [smem:[#allocation22_spill]]  ;;  %s3719_s1 = sld [smem:[#allocation24_spill]] }
 0xda1   : > { %s3720_s20 = sld [smem:[#allocation26_spill]]  ;;  %s3721_s21 = sld [smem:[#allocation28_spill]] }
 0xda2   : > { %s3722_s27 = smov %s2960_s28  ;;  %32 = sbr.rel (!%p30_p8) target bundleno = 19 (0x13), region = 169 }
 0xda3   : > { %s3723_s28 = smov %s3714_s0 }
 0xda5   : > { %s3724_s0 = smov %s3717_s17 }
 0xda9   :  { %2221 = vsyncpa [#allocation10], 1 }
 0xdaa   :  { %2223 = vsyncpa [#allocation10 + $0x1], 1 }
 0xdab   :  { %2224 = vsyncpa [#allocation13], 1 }
 0xdac   :  { %2225 = vsyncpa [#allocation11], 1 }
 0xdad   :  { %2227 = vsyncpa [#allocation11 + $0x1], 1 }

</bundles_post_ra>
